<compile_context>
chip_gen: v5e
topology: v5e:2x2
jax: 0.10.0
libtpu: 0.0.40
codegen_flags: <defaults>
</compile_context>

<pallas_src>
import jax
import jax.numpy as jnp
from jax.experimental import pallas as pl
from jax.experimental.pallas import tpu as pltpu

_IN_FEATURES = 28 * 28       # 784 (kernel K dim; Mosaic pads to 128-tiles in VMEM)
_HIDDEN = 512
_OUT_FEATURES = 10
_OUT_PADDED = 128            # lane-dense output width


def _mlp_kernel(x_ref, w1_ref, b1_ref, w2_ref, b2_ref, w3_ref, b3_ref, o_ref):
    # Cast the f32 activation tile to bf16 in VMEM (no extra HBM pass).
    x = x_ref[...].astype(jnp.bfloat16)

    # Layer 1: (TB, 784) @ (784, 512), bf16 operands, f32 accumulate, bias + ReLU.
    h = jnp.dot(x, w1_ref[...], preferred_element_type=jnp.float32)
    h = jnp.maximum(h + b1_ref[...], 0.0)

    # Layer 2: (TB, 512) @ (512, 512).
    h = jnp.dot(h.astype(jnp.bfloat16), w2_ref[...],
                preferred_element_type=jnp.float32)
    h = jnp.maximum(h + b2_ref[...], 0.0)

    # Layer 3: (TB, 512) @ (512, 128) -- lane-dense (zero-padded) logits.
    h = jnp.dot(h.astype(jnp.bfloat16), w3_ref[...],
                preferred_element_type=jnp.float32)
    o_ref[...] = jnp.maximum(h + b3_ref[...], 0.0)


def _round_up(n, m):
    return ((n + m - 1) // m) * m


def _choose_tb(B):
    """Batch tile: multiple of 16 (bf16 sublane packing), as large as possible
    while keeping batch-padding waste <=25% and (when B allows) >=2 grid steps
    so the megacore 'parallel' axis has something to shard on v7x."""
    B16 = _round_up(B, 16)
    if B16 <= 16:
        return 16
    for tb in (1024, 512, 256, 128, 64, 32, 16):
        if B16 >= 32 and tb > B16 // 2:
            continue                      # keep grid length >= 2
        pad = _round_up(B16, tb) - B16
        if pad * 4 <= B16:                # <= 25% padded rows
            return tb
    return 16


def prepare_params(w1, b1, w2, b2, w3, b3):
    """One-time weight conversion (bf16 + lane-pad of the final layer).

    Run once at init -- NOT inside the per-call forward -- so the cast/pad HBM
    passes do not repeat on every inference call."""
    w1_bf = w1.astype(jnp.bfloat16)
    w2_bf = w2.astype(jnp.bfloat16)
    w3_bf = jnp.pad(w3, ((0, 0), (0, _OUT_PADDED - _OUT_FEATURES))).astype(jnp.bfloat16)
    b3_p = jnp.pad(b3, ((0, 0), (0, _OUT_PADDED - _OUT_FEATURES)))
    return w1_bf, b1, w2_bf, b2, w3_bf, b3_p


@jax.jit
def neural_network_forward(x, w1_bf, b1, w2_bf, b2, w3_bf, b3_p):
    """x: (B, 28, 28) f32; pre-converted bf16 weights -> (B, 10) f32 logits."""
    B = x.shape[0]

    # nn.Flatten(); activations stay f32 (cast to bf16 inside the kernel).
    x_flat = x.reshape(B, _IN_FEATURES)

    TB = _choose_tb(B)
    B_pad = _round_up(B, TB)
    if B_pad != B:
        x_flat = jnp.pad(x_flat, ((0, B_pad - B), (0, 0)))

    grid = (B_pad // TB,)

    def resident(shape):  # weights/biases: same block every step -> VMEM-resident
        return pl.BlockSpec(shape, lambda i: (0, 0))
    # TODO(synk): single-buffer the resident weight blocks (pipeline_mode=
    # pl.Buffered(1)) once that path is verified on this jax version; saves
    # ~1.4 MiB VMEM of dead double-buffering.

    flops = 2 * B_pad * (_IN_FEATURES * _HIDDEN
                         + _HIDDEN * _HIDDEN
                         + _HIDDEN * _OUT_PADDED)
    bytes_accessed = (x_flat.size * 4
                      + w1_bf.size * 2 + w2_bf.size * 2 + w3_bf.size * 2
                      + b1.size * 4 + b2.size * 4 + b3_p.size * 4
                      + B_pad * _OUT_PADDED * 4)

    # ~4 MiB footprint at TB=256; larger tiles need more headroom (v7x: 64 MiB).
    vmem_limit = (32 if TB >= 512 else 16) * 1024 * 1024

    out = pl.pallas_call(
        _mlp_kernel,
        out_shape=jax.ShapeDtypeStruct((B_pad, _OUT_PADDED), jnp.float32),
        grid=grid,
        in_specs=[
            pl.BlockSpec((TB, _IN_FEATURES), lambda i: (i, 0)),   # x batch tile (f32)
            resident((_IN_FEATURES, _HIDDEN)), resident((1, _HIDDEN)),
            resident((_HIDDEN, _HIDDEN)), resident((1, _HIDDEN)),
            resident((_HIDDEN, _OUT_PADDED)), resident((1, _OUT_PADDED)),
        ],
        out_specs=pl.BlockSpec((TB, _OUT_PADDED), lambda i: (i, 0)),
        compiler_params=pltpu.CompilerParams(
            dimension_semantics=("parallel",),        # megacore sharding on v7x
            vmem_limit_bytes=vmem_limit,
        ),
        cost_estimate=pl.CostEstimate(
            flops=flops, transcendentals=0, bytes_accessed=bytes_accessed),
    )(x_flat, w1_bf, b1, w2_bf, b2, w3_bf, b3_p)

    # Drop batch padding and the lane padding of the final layer.
    return out[:B, :_OUT_FEATURES]


def _init_linear(key, fan_in, fan_out):
    """Deterministic init matching nn.Linear's default U(-1/sqrt(fan_in), ...)."""
    kw, kb = jax.random.split(key)
    bound = 1.0 / jnp.sqrt(jnp.float32(fan_in))
    w = jax.random.uniform(kw, (fan_in, fan_out), jnp.float32, -bound, bound)
    b = jax.random.uniform(kb, (1, fan_out), jnp.float32, -bound, bound)
    return w, b


if __name__ == "__main__":
    root = jax.random.PRNGKey(0)
    kx, k1, k2, k3 = jax.random.split(root, 4)

    # Small deterministic example input, matching `torch.rand(2, 28, 28)`.
    x = jax.random.uniform(kx, (2, 28, 28), jnp.float32)

    w1, b1 = _init_linear(k1, 28 * 28, 512)
    w2, b2 = _init_linear(k2, 512, 512)
    w3, b3 = _init_linear(k3, 512, 10)

    # One-time weight conversion (outside the per-call forward).
    params = jax.block_until_ready(prepare_params(w1, b1, w2, b2, w3, b3))

    logits = neural_network_forward(x, *params)
    logits = jax.block_until_ready(logits)

    # Full-f32 reference in plain JAX (kernel uses bf16 weights/activations on
    # the MXU with f32 accumulation, so allow small drift).
    ref = x.reshape(2, -1)
    ref = jnp.maximum(ref @ w1 + b1, 0.0)
    ref = jnp.maximum(ref @ w2 + b2, 0.0)
    ref = jnp.maximum(ref @ w3 + b3, 0.0)

    assert logits.shape == (2, 10)
    assert jnp.allclose(logits, ref, atol=2e-2, rtol=2e-2), float(
        jnp.max(jnp.abs(logits - ref)))

    print("KERNEL_OK")
</pallas_src>

<mosaic_0001>
module attributes {stable_mosaic.version = 11 : i64} {
  func.func @_mlp_kernel(%arg0: i32, %arg1: memref<16x784xf32, #tpu.memory_space<vmem>>, %arg2: memref<784x512xbf16, #tpu.memory_space<vmem>>, %arg3: memref<1x512xf32, #tpu.memory_space<vmem>>, %arg4: memref<512x512xbf16, #tpu.memory_space<vmem>>, %arg5: memref<1x512xf32, #tpu.memory_space<vmem>>, %arg6: memref<512x128xbf16, #tpu.memory_space<vmem>>, %arg7: memref<1x128xf32, #tpu.memory_space<vmem>>, %arg8: memref<16x128xf32, #tpu.memory_space<vmem>>) attributes {dimension_semantics = [#tpu.dimension_semantics<parallel>], iteration_bounds = array<i64: 1>, scalar_prefetch = 0 : i64, scratch_operands = 0 : i64, tpu.core_type = #tpu.core_type<tc>, window_params = [{transform_indices = @transform_0, window_bounds = array<i64: 16, 784>}, {pipeline_mode = #tpu.pipeline_mode<synchronous>, transform_indices = @transform_1, window_bounds = array<i64: 784, 512>}, {pipeline_mode = #tpu.pipeline_mode<synchronous>, transform_indices = @transform_2, window_bounds = array<i64: 1, 512>}, {pipeline_mode = #tpu.pipeline_mode<synchronous>, transform_indices = @transform_3, window_bounds = array<i64: 512, 512>}, {pipeline_mode = #tpu.pipeline_mode<synchronous>, transform_indices = @transform_4, window_bounds = array<i64: 1, 512>}, {pipeline_mode = #tpu.pipeline_mode<synchronous>, transform_indices = @transform_5, window_bounds = array<i64: 512, 128>}, {pipeline_mode = #tpu.pipeline_mode<synchronous>, transform_indices = @transform_6, window_bounds = array<i64: 1, 128>}, {transform_indices = @transform_7, window_bounds = array<i64: 16, 128>}]} {
    %c0 = arith.constant 0 : index
    %c0_0 = arith.constant 0 : index
    %0 = vector.load %arg1[%c0, %c0_0] : memref<16x784xf32, #tpu.memory_space<vmem>>, vector<16x784xf32>
    %1 = arith.truncf %0 : vector<16x784xf32> to vector<16x784xbf16>
    %c0_1 = arith.constant 0 : index
    %c0_2 = arith.constant 0 : index
    %2 = vector.load %arg2[%c0_1, %c0_2] : memref<784x512xbf16, #tpu.memory_space<vmem>>, vector<784x512xbf16>
    %cst = arith.constant dense<0.000000e+00> : vector<16x512xf32>
    %3 = tpu.matmul %1, %2, %cst {dimension_numbers = #tpu.dot_dimension_numbers<[1], [0], [0], [1], [0, 0, 1, 1], [], []>} : vector<16x784xbf16>, vector<784x512xbf16>, vector<16x512xf32> -> vector<16x512xf32>
    %c0_3 = arith.constant 0 : index
    %c0_4 = arith.constant 0 : index
    %4 = vector.load %arg3[%c0_3, %c0_4] : memref<1x512xf32, #tpu.memory_space<vmem>>, vector<1x512xf32>
    %5 = vector.broadcast %4 : vector<1x512xf32> to vector<16x512xf32>
    %6 = arith.addf %3, %5 : vector<16x512xf32>
    %cst_5 = arith.constant 0.000000e+00 : f32
    %7 = vector.broadcast %cst_5 : f32 to vector<16x512xf32>
    %8 = arith.maximumf %6, %7 : vector<16x512xf32>
    %9 = arith.truncf %8 : vector<16x512xf32> to vector<16x512xbf16>
    %c0_6 = arith.constant 0 : index
    %c0_7 = arith.constant 0 : index
    %10 = vector.load %arg4[%c0_6, %c0_7] : memref<512x512xbf16, #tpu.memory_space<vmem>>, vector<512x512xbf16>
    %cst_8 = arith.constant dense<0.000000e+00> : vector<16x512xf32>
    %11 = tpu.matmul %9, %10, %cst_8 {dimension_numbers = #tpu.dot_dimension_numbers<[1], [0], [0], [1], [0, 0, 1, 1], [], []>} : vector<16x512xbf16>, vector<512x512xbf16>, vector<16x512xf32> -> vector<16x512xf32>
    %c0_9 = arith.constant 0 : index
    %c0_10 = arith.constant 0 : index
    %12 = vector.load %arg5[%c0_9, %c0_10] : memref<1x512xf32, #tpu.memory_space<vmem>>, vector<1x512xf32>
    %13 = vector.broadcast %12 : vector<1x512xf32> to vector<16x512xf32>
    %14 = arith.addf %11, %13 : vector<16x512xf32>
    %cst_11 = arith.constant 0.000000e+00 : f32
    %15 = vector.broadcast %cst_11 : f32 to vector<16x512xf32>
    %16 = arith.maximumf %14, %15 : vector<16x512xf32>
    %17 = arith.truncf %16 : vector<16x512xf32> to vector<16x512xbf16>
    %c0_12 = arith.constant 0 : index
    %c0_13 = arith.constant 0 : index
    %18 = vector.load %arg6[%c0_12, %c0_13] : memref<512x128xbf16, #tpu.memory_space<vmem>>, vector<512x128xbf16>
    %cst_14 = arith.constant dense<0.000000e+00> : vector<16x128xf32>
    %19 = tpu.matmul %17, %18, %cst_14 {dimension_numbers = #tpu.dot_dimension_numbers<[1], [0], [0], [1], [0, 0, 1, 1], [], []>} : vector<16x512xbf16>, vector<512x128xbf16>, vector<16x128xf32> -> vector<16x128xf32>
    %c0_15 = arith.constant 0 : index
    %c0_16 = arith.constant 0 : index
    %20 = vector.load %arg7[%c0_15, %c0_16] : memref<1x128xf32, #tpu.memory_space<vmem>>, vector<1x128xf32>
    %21 = vector.broadcast %20 : vector<1x128xf32> to vector<16x128xf32>
    %22 = arith.addf %19, %21 : vector<16x128xf32>
    %cst_17 = arith.constant 0.000000e+00 : f32
    %23 = vector.broadcast %cst_17 : f32 to vector<16x128xf32>
    %24 = arith.maximumf %22, %23 : vector<16x128xf32>
    %c0_18 = arith.constant 0 : index
    %c0_19 = arith.constant 0 : index
    %25 = vector.load %arg8[%c0_18, %c0_19] : memref<16x128xf32, #tpu.memory_space<vmem>>, vector<16x128xf32>
    tpu.vector_store %arg8[%c0_18, %c0_19], %24 {strides = array<i32>} : memref<16x128xf32, #tpu.memory_space<vmem>>, vector<16x128xf32>,
    return
  }
  func.func @transform_0(%arg0: i32) -> (i32, i32) {
    %c0_i32 = arith.constant 0 : i32
    %c0_i32_0 = arith.constant 0 : i32
    return %arg0, %c0_i32 : i32, i32
  }
  func.func @transform_1(%arg0: i32) -> (i32, i32) {
    %c0_i32 = arith.constant 0 : i32
    %c0_i32_0 = arith.constant 0 : i32
    %c0_i32_1 = arith.constant 0 : i32
    return %c0_i32, %c0_i32_0 : i32, i32
  }
  func.func @transform_2(%arg0: i32) -> (i32, i32) {
    %c0_i32 = arith.constant 0 : i32
    %c0_i32_0 = arith.constant 0 : i32
    %c0_i32_1 = arith.constant 0 : i32
    return %c0_i32, %c0_i32_0 : i32, i32
  }
  func.func @transform_3(%arg0: i32) -> (i32, i32) {
    %c0_i32 = arith.constant 0 : i32
    %c0_i32_0 = arith.constant 0 : i32
    %c0_i32_1 = arith.constant 0 : i32
    return %c0_i32, %c0_i32_0 : i32, i32
  }
  func.func @transform_4(%arg0: i32) -> (i32, i32) {
    %c0_i32 = arith.constant 0 : i32
    %c0_i32_0 = arith.constant 0 : i32
    %c0_i32_1 = arith.constant 0 : i32
    return %c0_i32, %c0_i32_0 : i32, i32
  }
  func.func @transform_5(%arg0: i32) -> (i32, i32) {
    %c0_i32 = arith.constant 0 : i32
    %c0_i32_0 = arith.constant 0 : i32
    %c0_i32_1 = arith.constant 0 : i32
    return %c0_i32, %c0_i32_0 : i32, i32
  }
  func.func @transform_6(%arg0: i32) -> (i32, i32) {
    %c0_i32 = arith.constant 0 : i32
    %c0_i32_0 = arith.constant 0 : i32
    %c0_i32_1 = arith.constant 0 : i32
    return %c0_i32, %c0_i32_0 : i32, i32
  }
  func.func @transform_7(%arg0: i32) -> (i32, i32) {
    %c0_i32 = arith.constant 0 : i32
    %c0_i32_0 = arith.constant 0 : i32
    return %arg0, %c0_i32 : i32, i32
  }
}

</mosaic_0001>

<bundles_post_ra>
// kernel: neural_network_forward.1
= control target key start
LH: loop header
LB: loop body
LE: loop exit
PB: predicated region body
PF: predicated region fallthrough
CT: control target
= control target key end

     0   :  { %12 = vsyncpa [#allocation3], 0  ;;  %s5161_s0 = inlined_call_operand.vmem [shape: f32[16,784], index: 0, kind: input, shape index: {}]   ;;  %s5162_s1 = inlined_call_operand.hbm [shape: bf16[784,512], index: 1, kind: input, shape index: {}]   ;;  %s5163_s2 = inlined_call_operand.vmem [shape: f32[1,512], index: 2, kind: input, shape index: {}]   ;;  %s5164_s3 = inlined_call_operand.hbm [shape: bf16[512,512], index: 3, kind: input, shape index: {}]   ;;  %s5165_s4 = inlined_call_operand.vmem [shape: f32[1,512], index: 4, kind: input, shape index: {}]   ;;  %s5166_s5 = inlined_call_operand.vmem [shape: bf16[512,128], index: 5, kind: input, shape index: {}]   ;;  %s5167_s6 = inlined_call_operand.vmem [shape: f32[1,128], index: 6, kind: input, shape index: {}]   ;;  %s5168_s7 = inlined_call_operand.vmem [shape: f32[16,128], index: 7, kind: output, shape index: {}]  }
   0x1   :  { %s20_s26 = sshll.u32 %s5162_s1, 4  ;;  %s21_s26 = int_to_ptr.hbm [resolvable:$true] %s20_s26 }
   0x2   :  { %13 = vsyncpa [#allocation5], 0  ;;  %s4855_s27 = smov [#allocation2]   ;;  %s35_s8 = sshll.u32 %s5164_s3, 4  ;;  %s36_s8 = int_to_ptr.hbm [resolvable:$true] %s35_s8 }
   0x3   :  { %s22_s28 = sshll.u32 %s4855_s27, 4  ;;  %s4856_s9 = smov 256   ;;  %s23_s28 = int_to_ptr.vmem [resolvable:$true] %s22_s28 }
   0x4   :  { %s4857_s10 = smov 16   ;;  %s4858_s11 = smov [#allocation4]  }
   0x5   :  { %28 = dma.hbm_to_vmem [thread:$0]  %s21_s26, 25088, %s23_s28, [#allocation3], %s4856_s9, %s4856_s9, %s4857_s10  }
   0x6   :  { %s37_s12 = sshll.u32 %s4858_s11, 4  ;;  %s38_s12 = int_to_ptr.vmem [resolvable:$true] %s37_s12 }
   0x7   :  { %43 = dma.hbm_to_vmem [thread:$0]  %s36_s8, 16384, %s38_s12, [#allocation5], %s4856_s9, %s4856_s9, %s4857_s10  }
   0x8   :  { %4851 = dma.done.wait [#allocation3], 25088  }
   0x9   :  { %4852 = vsyncadd [#allocation3], 4294942208 }
   0xa   :  { %4853 = dma.done.wait [#allocation5], 16384  }
   0xb   :  { %4854 = vsyncadd [#allocation5], 4294950912  ;;  %v3128_v0 = vld [vmem:[#allocation2 + $0xe0] sm:$0xf]  ;;  %v4472_v1 = vld [vmem:[#allocation2 + $0xec] sm:$0xf0] }
   0xc   :  { %v3256_v2 = vld [vmem:[#allocation2 + $0x1e0] sm:$0xf]  ;;  %v3129_v3 = vor.u32 %v4472_v1, %v3128_v0  ;;  %v4504_v4 = vld [vmem:[#allocation2 + $0x1ec] sm:$0xf0]  ;;  %vm1266_vm0 = vcmask 130048  }
   0xd   :  { %v3384_v5 = vld [vmem:[#allocation2 + $0x2e0] sm:$0xf]  ;;  %v4536_v6 = vld [vmem:[#allocation2 + $0x2ec] sm:$0xf0]  ;;  %v3257_v7 = vor.u32 %v4504_v4, %v3256_v2 }
   0xe   :  { %v3385_v8 = vor.u32 %v4536_v6, %v3384_v5  ;;  %v3512_v9 = vld [vmem:[#allocation2 + $0x3e0] sm:$0xf]  ;;  %v4568_v10 = vld [vmem:[#allocation2 + $0x3ec] sm:$0xf0]  ;;  %1270 = vmatpush.bf16.msra.mxu0 %v3129_v3 }
   0xf   :  { %v3112_v11 = vld [vmem:[#allocation2 + $0xc0] sm:$0xf]  ;;  %v3513_v12 = vor.u32 %v4568_v10, %v3512_v9  ;;  %v4468_v13 = vld [vmem:[#allocation2 + $0xcc] sm:$0xf0]  ;;  %1284 = vmatpush.bf16.msra.mxu1 %v3257_v7 }
  0x10   :  { %v3240_v14 = vld [vmem:[#allocation2 + $0x1c0] sm:$0xf]  ;;  %v4500_v15 = vld [vmem:[#allocation2 + $0x1cc] sm:$0xf0]  ;;  %1298 = vmatpush.bf16.msra.mxu2 %v3385_v8  ;;  %v3113_v16 = vor.u32 %v4468_v13, %v3112_v11 }
  0x11   :  { %v3241_v17 = vor.u32 %v4500_v15, %v3240_v14  ;;  %v3368_v18 = vld [vmem:[#allocation2 + $0x2c0] sm:$0xf]  ;;  %v4532_v19 = vld [vmem:[#allocation2 + $0x2cc] sm:$0xf0]  ;;  %1312 = vmatpush.bf16.msra.mxu3 %v3513_v12 }
  0x12   :  { %v3496_v20 = vld [vmem:[#allocation2 + $0x3c0] sm:$0xf]  ;;  %v3369_v21 = vor.u32 %v4532_v19, %v3368_v18  ;;  %v4564_v22 = vld [vmem:[#allocation2 + $0x3cc] sm:$0xf0]  ;;  %1271 = vmatpush.bf16.msra.mxu0 %v3113_v16 }
  0x13   :  { %v3096_v23 = vld [vmem:[#allocation2 + $0xa0] sm:$0xf]  ;;  %v4464_v24 = vld [vmem:[#allocation2 + $0xac] sm:$0xf0]  ;;  %v3497_v25 = vor.u32 %v4564_v22, %v3496_v20  ;;  %1285 = vmatpush.bf16.msra.mxu1 %v3241_v17 }
  0x14   :  { %v3224_v26 = vld [vmem:[#allocation2 + $0x1a0] sm:$0xf]  ;;  %v4496_v27 = vld [vmem:[#allocation2 + $0x1ac] sm:$0xf0]  ;;  %v3097_v29 = vor.u32 %v4464_v24, %v3096_v23  ;;  %1299 = vmatpush.bf16.msra.mxu2 %v3369_v21 }
  0x15   :  { %v3352_v28 = vld [vmem:[#allocation2 + $0x2a0] sm:$0xf]  ;;  %v4528_v30 = vld [vmem:[#allocation2 + $0x2ac] sm:$0xf0]  ;;  %v3225_v33 = vor.u32 %v4496_v27, %v3224_v26  ;;  %1313 = vmatpush.bf16.msra.mxu3 %v3497_v25 }
  0x16   :  { %v3480_v31 = vld [vmem:[#allocation2 + $0x3a0] sm:$0xf]  ;;  %v4560_v32 = vld [vmem:[#allocation2 + $0x3ac] sm:$0xf0]  ;;  %v3353_v34 = vor.u32 %v4528_v30, %v3352_v28  ;;  %1272 = vmatpush.bf16.msra.mxu0 %v3097_v29 }
  0x17   :  { %v3080_v35 = vld [vmem:[#allocation2 + $0x80] sm:$0xf]  ;;  %v4460_v36 = vld [vmem:[#allocation2 + $0x8c] sm:$0xf0]  ;;  %v3481_v38 = vor.u32 %v4560_v32, %v3480_v31  ;;  %1286 = vmatpush.bf16.msra.mxu1 %v3225_v33  ;;  %v4470_v32 = vld [vmem:[#allocation2 + $0xe4] sm:$0xf] }
  0x18   :  { %v3208_v37 = vld [vmem:[#allocation2 + $0x180] sm:$0xf]  ;;  %v4492_v39 = vld [vmem:[#allocation2 + $0x18c] sm:$0xf0]  ;;  %v3081_v44 = vor.u32 %v4460_v36, %v3080_v35  ;;  %1300 = vmatpush.bf16.msra.mxu2 %v3353_v34  ;;  %v3130_v33 = vld [vmem:[#allocation2 + $0xf0] sm:$0xf0] }
  0x19   :  { %v3336_v40 = vld [vmem:[#allocation2 + $0x280] sm:$0xf]  ;;  %v4524_v41 = vld [vmem:[#allocation2 + $0x28c] sm:$0xf0]  ;;  %v3209_v45 = vor.u32 %v4492_v39, %v3208_v37  ;;  %1314 = vmatpush.bf16.msra.mxu3 %v3481_v38  ;;  %v68_v36 = vld [vmem:[%s5161_s0 + $0x48] sm:$0xff] }
  0x1a   :  { %v3464_v42 = vld [vmem:[#allocation2 + $0x380] sm:$0xf]  ;;  %v4556_v43 = vld [vmem:[#allocation2 + $0x38c] sm:$0xf0]  ;;  %v3337_v46 = vor.u32 %v4524_v41, %v3336_v40  ;;  %1273 = vmatpush.bf16.msra.mxu0 %v3081_v44  ;;  %v4502_v41 = vld [vmem:[#allocation2 + $0x1e4] sm:$0xf] }
  0x1b   :  { %v3064_v47 = vld [vmem:[#allocation2 + $0x60] sm:$0xf]  ;;  %v4456_v48 = vld [vmem:[#allocation2 + $0x6c] sm:$0xf0]  ;;  %v3465_v50 = vor.u32 %v4556_v43, %v3464_v42  ;;  %1287 = vmatpush.bf16.msra.mxu1 %v3209_v45  ;;  %v66_v43 = vld [vmem:[%s5161_s0 + $0x38] sm:$0xff] }
  0x1c   :  { %v3192_v49 = vld [vmem:[#allocation2 + $0x160] sm:$0xf]  ;;  %v4488_v51 = vld [vmem:[#allocation2 + $0x16c] sm:$0xf0]  ;;  %v3065_v56 = vor.u32 %v4456_v48, %v3064_v47  ;;  %1301 = vmatpush.bf16.msra.mxu2 %v3337_v46  ;;  %v3258_v46 = vld [vmem:[#allocation2 + $0x1f0] sm:$0xf0] }
  0x1d   :  { %v3320_v52 = vld [vmem:[#allocation2 + $0x260] sm:$0xf]  ;;  %v4520_v53 = vld [vmem:[#allocation2 + $0x26c] sm:$0xf0]  ;;  %v3193_v57 = vor.u32 %v4488_v51, %v3192_v49  ;;  %1315 = vmatpush.bf16.msra.mxu3 %v3465_v50  ;;  %v62_v47 = vld [vmem:[%s5161_s0 + $0x18] sm:$0xff]  ;;  %v3133_v50 = vor.u32 %v4470_v32, %v3130_v33 }
  0x1e   :  { %v3448_v54 = vld [vmem:[#allocation2 + $0x360] sm:$0xf]  ;;  %v4552_v55 = vld [vmem:[#allocation2 + $0x36c] sm:$0xf0]  ;;  %v3321_v58 = vor.u32 %v4520_v53, %v3320_v52  ;;  %1274 = vmatpush.bf16.msra.mxu0 %v3065_v56 }
  0x1f   :  { %v3048_v59 = vld [vmem:[#allocation2 + $0x40] sm:$0xf]  ;;  %v4452_v60 = vld [vmem:[#allocation2 + $0x4c] sm:$0xf0]  ;;  %v3449_v62 = vor.u32 %v4552_v55, %v3448_v54  ;;  %1288 = vmatpush.bf16.msra.mxu1 %v3193_v57  ;;  %v4466_v57 = vld [vmem:[#allocation2 + $0xc4] sm:$0xf] }
  0x20   :  { %v3176_v61 = vld [vmem:[#allocation2 + $0x140] sm:$0xf]  ;;  %v4484_v63 = vld [vmem:[#allocation2 + $0x14c] sm:$0xf0]  ;;  %v3049_v4 = vor.u32 %v4452_v60, %v3048_v59  ;;  %1302 = vmatpush.bf16.msra.mxu2 %v3321_v58  ;;  %v3114_v58 = vld [vmem:[#allocation2 + $0xd0] sm:$0xf0] }
  0x21   :  { %v3304_v0 = vld [vmem:[#allocation2 + $0x240] sm:$0xf]  ;;  %v4516_v1 = vld [vmem:[#allocation2 + $0x24c] sm:$0xf0]  ;;  %v3177_v6 = vor.u32 %v4484_v63, %v3176_v61  ;;  %1316 = vmatpush.bf16.msra.mxu3 %v3449_v62  ;;  %v60_v61 = vld [vmem:[%s5161_s0 + $0x8] sm:$0xff]  ;;  %v3261_v63 = vor.u32 %v4502_v41, %v3258_v46 }
  0x22   :  { %v3432_v2 = vld [vmem:[#allocation2 + $0x340] sm:$0xf]  ;;  %v4548_v3 = vld [vmem:[#allocation2 + $0x34c] sm:$0xf0]  ;;  %v3305_v7 = vor.u32 %v4516_v1, %v3304_v0  ;;  %1275 = vmatpush.bf16.msra.mxu0 %v3049_v4  ;;  %v4498_v1 = vld [vmem:[#allocation2 + $0x1c4] sm:$0xf]  ;;  %v3117_v4 = vor.u32 %v4466_v57, %v3114_v58 }
  0x23   :  { %v3032_v5 = vld [vmem:[#allocation2 + $0x20] sm:$0xf]  ;;  %v4448_v8 = vld [vmem:[#allocation2 + $0x2c] sm:$0xf0]  ;;  %v3433_v11 = vor.u32 %v4548_v3, %v3432_v2  ;;  %1289 = vmatpush.bf16.msra.mxu1 %v3177_v6  ;;  %v3242_v2 = vld [vmem:[#allocation2 + $0x1d0] sm:$0xf0] }
  0x24   :  { %v3160_v9 = vld [vmem:[#allocation2 + $0x120] sm:$0xf]  ;;  %v4480_v10 = vld [vmem:[#allocation2 + $0x12c] sm:$0xf0]  ;;  %v3033_v18 = vor.u32 %v4448_v8, %v3032_v5  ;;  %1303 = vmatpush.bf16.msra.mxu2 %v3305_v7  ;;  %v3194_v41 = vld [vmem:[#allocation2 + $0x170] sm:$0xf0] }
  0x25   :  { %v3288_v12 = vld [vmem:[#allocation2 + $0x220] sm:$0xf]  ;;  %v4512_v13 = vld [vmem:[#allocation2 + $0x22c] sm:$0xf0]  ;;  %v3161_v23 = vor.u32 %v4480_v10, %v3160_v9  ;;  %1317 = vmatpush.bf16.msra.mxu3 %v3433_v11  ;;  %v4462_v10 = vld [vmem:[#allocation2 + $0xa4] sm:$0xf] }
  0x26   :  { %v3416_v14 = vld [vmem:[#allocation2 + $0x320] sm:$0xf]  ;;  %v4544_v15 = vld [vmem:[#allocation2 + $0x32c] sm:$0xf0]  ;;  %v3289_v24 = vor.u32 %v4512_v13, %v3288_v12  ;;  %1276 = vmatpush.bf16.msra.mxu0 %v3033_v18  ;;  %v3098_v11 = vld [vmem:[#allocation2 + $0xb0] sm:$0xf0]  ;;  %v3245_v12 = vor.u32 %v4498_v1, %v3242_v2 }
  0x27   :  { %v3016_v16 = vld [vmem:[#allocation2] sm:$0xf]  ;;  %v4444_v17 = vld [vmem:[#allocation2 + $0xc] sm:$0xf0]  ;;  %v3417_v28 = vor.u32 %v4544_v15, %v3416_v14  ;;  %1290 = vmatpush.bf16.msra.mxu1 %v3161_v23  ;;  %v4494_v14 = vld [vmem:[#allocation2 + $0x1a4] sm:$0xf] }
  0x28   :  { %v3144_v19 = vld [vmem:[#allocation2 + $0x100] sm:$0xf]  ;;  %v4476_v20 = vld [vmem:[#allocation2 + $0x10c] sm:$0xf0]  ;;  %v3017_v35 = vor.u32 %v4444_v17, %v3016_v16  ;;  %1304 = vmatpush.bf16.msra.mxu2 %v3289_v24  ;;  %v3226_v15 = vld [vmem:[#allocation2 + $0x1b0] sm:$0xf0]  ;;  %v3101_v17 = vor.u32 %v4462_v10, %v3098_v11 }
  0x29   :  { %v3272_v21 = vld [vmem:[#allocation2 + $0x200] sm:$0xf]  ;;  %v4508_v22 = vld [vmem:[#allocation2 + $0x20c] sm:$0xf0]  ;;  %v3145_v39 = vor.u32 %v4476_v20, %v3144_v19  ;;  %1318 = vmatpush.bf16.msra.mxu3 %v3417_v28  ;;  %v3082_v23 = vld [vmem:[#allocation2 + $0x90] sm:$0xf0]  ;;  %v3229_v24 = vor.u32 %v4494_v14, %v3226_v15 }
  0x2a   :  { %v3400_v25 = vld [vmem:[#allocation2 + $0x300] sm:$0xf]  ;;  %v4540_v26 = vld [vmem:[#allocation2 + $0x30c] sm:$0xf0]  ;;  %v3273_v40 = vor.u32 %v4508_v22, %v3272_v21  ;;  %1277 = vmatpush.bf16.msra.mxu0 %v3017_v35  ;;  %v4458_v22 = vld [vmem:[#allocation2 + $0x84] sm:$0xf] }
  0x2b   :  { %v3640_v27 = vld [vmem:[#allocation2 + $0x4e0] sm:$0xf]  ;;  %v4600_v29 = vld [vmem:[#allocation2 + $0x4ec] sm:$0xf0]  ;;  %v3401_v44 = vor.u32 %v4540_v26, %v3400_v25  ;;  %1291 = vmatpush.bf16.msra.mxu1 %v3145_v39  ;;  %v4490_v26 = vld [vmem:[#allocation2 + $0x184] sm:$0xf] }
  0x2c   :  { %v3768_v30 = vld [vmem:[#allocation2 + $0x5e0] sm:$0xf]  ;;  %v4632_v31 = vld [vmem:[#allocation2 + $0x5ec] sm:$0xf0]  ;;  %v3641_v45 = vor.u32 %v4600_v29, %v3640_v27  ;;  %1305 = vmatpush.bf16.msra.mxu2 %v3273_v40  ;;  %v3210_v27 = vld [vmem:[#allocation2 + $0x190] sm:$0xf0]  ;;  %v3085_v29 = vor.u32 %v4458_v22, %v3082_v23 }
  0x2d   :  { %v61_v34 = vld [vmem:[%s5161_s0 + $0x10] sm:$0xff]  ;;  %v3784_v37 = vld [vmem:[#allocation2 + $0x600] sm:$0xf]  ;;  %v3769_v49 = vor.u32 %v4632_v31, %v3768_v30  ;;  %1319 = vmatpush.bf16.msra.mxu3 %v3401_v44  ;;  %v4486_v40 = vld [vmem:[#allocation2 + $0x164] sm:$0xf] }
  0x2e   :  { %v4636_v38 = vld [vmem:[#allocation2 + $0x60c] sm:$0xf0]  ;;  %v59_v42 = vld [vmem:[%s5161_s0] sm:$0xff]  ;;  %v4923_v54 = vpack.c.bf16 %v68_v36, %v61_v34  ;;  %1326 = vmatpush.bf16.msrb.mxu0 %v3641_v45  ;;  %v3066_v35 = vld [vmem:[#allocation2 + $0x70] sm:$0xf0] }
  0x2f   :  { %v69_v48 = vld [vmem:[%s5161_s0 + $0x50] sm:$0xff]  ;;  %v3624_v51 = vld [vmem:[#allocation2 + $0x4c0] sm:$0xf]  ;;  %v4925_v55 = vpack.c.bf16 %v66_v43, %v59_v42  ;;  %v3785_v59 = vor.u32 %v4636_v38, %v3784_v37  ;;  %1340 = vmatpush.bf16.msrb.mxu1 %v3769_v49  ;;  %v4454_v34 = vld [vmem:[#allocation2 + $0x64] sm:$0xf]  ;;  %v3213_v38 = vor.u32 %v4490_v26, %v3210_v27 }
  0x30   :  { %v4596_v52 = vld [vmem:[#allocation2 + $0x4cc] sm:$0xf0]  ;;  %v3752_v53 = vld [vmem:[#allocation2 + $0x5c0] sm:$0xf]  ;;  %v4927_v60 = vpack.c.bf16 %v69_v48, %v62_v47  ;;  %1306 = vmatmul.bf16.vlgmr.msra.gmra.mxu2 %v4923_v54  ;;  %v72_v37 = vld [vmem:[%s5161_s0 + $0x68] sm:$0xff]  ;;  %v3069_v43 = vor.u32 %v4454_v34, %v3066_v35 }
  0x31   :  { %v4628_v56 = vld [vmem:[#allocation2 + $0x5cc] sm:$0xf0]  ;;  %v67_v62 = vld [vmem:[%s5161_s0 + $0x40] sm:$0xff]  ;;  %v3625_v0 = vor.u32 %v4596_v52, %v3624_v51  ;;  %1368 = vmatpush.bf16.msrb.mxu3 %v3133_v50  ;;  %1278 = vmatmul.bf16.vlgmr.msra.gmra.mxu0 %v4925_v55  ;;  %v3050_v49 = vld [vmem:[#allocation2 + $0x50] sm:$0xf0]  ;;  %v3197_v51 = vor.u32 %v4486_v40, %v3194_v41 }
  0x32   :  { %v3753_v3 = vor.u32 %v4628_v56, %v3752_v53  ;;  %v3608_v5 = vld [vmem:[#allocation2 + $0x4a0] sm:$0xf]  ;;  %v4592_v6 = vld [vmem:[#allocation2 + $0x4ac] sm:$0xf0]  ;;  %v4937_v8 = vpack.c.bf16 %v67_v62, %v60_v61  ;;  %1361 = vmatpush.bf16.msrb.mxu2 %v3785_v59  ;;  %1320 = vmatmul.bf16.vlgmr.msra.gmra.mxu3 %v4927_v60  ;;  %v4450_v48 = vld [vmem:[#allocation2 + $0x44] sm:$0xf] }
  0x33   :  { %v3736_v7 = vld [vmem:[#allocation2 + $0x5a0] sm:$0xf]  ;;  %v4624_v9 = vld [vmem:[#allocation2 + $0x5ac] sm:$0xf0]  ;;  %1327 = vmatpush.bf16.msrb.mxu0 %v3625_v0  ;;  %v3609_v13 = vor.u32 %v4592_v6, %v3608_v5  ;;  %v4482_v53 = vld [vmem:[#allocation2 + $0x144] sm:$0xf]  ;;  %v3053_v58 = vor.u32 %v4450_v48, %v3050_v49 }
  0x34   :  { %1341 = vmatpush.bf16.msrb.mxu1 %v3753_v3  ;;  %v3737_v16 = vor.u32 %v4624_v9, %v3736_v7  ;;  %v3592_v18 = vld [vmem:[#allocation2 + $0x480] sm:$0xf]  ;;  %v4588_v19 = vld [vmem:[#allocation2 + $0x48c] sm:$0xf0]  ;;  %v3178_v56 = vld [vmem:[#allocation2 + $0x150] sm:$0xf0] }
  0x35   :  { %1369 = vmatpush.bf16.msrb.mxu3 %v3117_v4  ;;  %v3720_v20 = vld [vmem:[#allocation2 + $0x580] sm:$0xf]  ;;  %1292 = vmatmul.bf16.vlgmr.msra.gmra.mxu1 %v4937_v8  ;;  %v4620_v21 = vld [vmem:[#allocation2 + $0x58c] sm:$0xf0]  ;;  %v3593_v25 = vor.u32 %v4588_v19, %v3592_v18  ;;  %v4446_v0 = vld [vmem:[#allocation2 + $0x24] sm:$0xf]  ;;  %v3181_v4 = vor.u32 %v4482_v53, %v3178_v56 }
  0x36   :  { %1382 = vmatpush.bf16.msra.mxu2 %v3261_v63  ;;  %v3721_v28 = vor.u32 %v4620_v21, %v3720_v20  ;;  %v3576_v30 = vld [vmem:[#allocation2 + $0x460] sm:$0xf]  ;;  %v4584_v31 = vld [vmem:[#allocation2 + $0x46c] sm:$0xf0]  ;;  %v3034_v1 = vld [vmem:[#allocation2 + $0x30] sm:$0xf0] }
  0x37   :  { %1328 = vmatpush.bf16.msrb.mxu0 %v3609_v13  ;;  %v3704_v32 = vld [vmem:[#allocation2 + $0x560] sm:$0xf]  ;;  %v4616_v33 = vld [vmem:[#allocation2 + $0x56c] sm:$0xf0]  ;;  %v3577_v39 = vor.u32 %v4584_v31, %v3576_v30  ;;  %v4478_v2 = vld [vmem:[#allocation2 + $0x124] sm:$0xf]  ;;  %v3037_v11 = vor.u32 %v4446_v0, %v3034_v1 }
  0x38   :  { %1342 = vmatpush.bf16.msrb.mxu1 %v3737_v16  ;;  %v65_v36 = vld [vmem:[%s5161_s0 + $0x30] sm:$0xff]  ;;  %v3705_v42 = vor.u32 %v4616_v33, %v3704_v32  ;;  %v3560_v44 = vld [vmem:[#allocation2 + $0x440] sm:$0xf]  ;;  %v4442_v13 = vld [vmem:[#allocation2 + $0x4] sm:$0xf] }
  0x39   :  { %1370 = vmatpush.bf16.msrb.mxu3 %v3101_v17  ;;  %v4580_v45 = vld [vmem:[#allocation2 + $0x44c] sm:$0xf0]  ;;  %v3688_v46 = vld [vmem:[#allocation2 + $0x540] sm:$0xf]  ;;  %v4947_v50 = vpack.c.bf16 %v72_v37, %v65_v36  ;;  %v3162_v3 = vld [vmem:[#allocation2 + $0x130] sm:$0xf0] }
  0x3a   :  { %1383 = vmatpush.bf16.msra.mxu2 %v3245_v12  ;;  %v4612_v47 = vld [vmem:[#allocation2 + $0x54c] sm:$0xf0]  ;;  %v3561_v52 = vor.u32 %v4580_v45, %v3560_v44  ;;  %v3544_v59 = vld [vmem:[#allocation2 + $0x420] sm:$0xf]  ;;  %v3018_v14 = vld [vmem:[#allocation2 + $0x10] sm:$0xf0]  ;;  %v3165_v21 = vor.u32 %v4478_v2, %v3162_v3 }
  0x3b   :  { %1329 = vmatpush.bf16.msrb.mxu0 %v3593_v25  ;;  %v3689_v57 = vor.u32 %v4612_v47, %v3688_v46  ;;  %v4576_v61 = vld [vmem:[#allocation2 + $0x42c] sm:$0xf0]  ;;  %v3672_v62 = vld [vmem:[#allocation2 + $0x520] sm:$0xf]  ;;  %v4534_v15 = vld [vmem:[#allocation2 + $0x2e4] sm:$0xf]  ;;  %v3021_v27 = vor.u32 %v4442_v13, %v3018_v14 }
  0x3c   :  { %1343 = vmatpush.bf16.msrb.mxu1 %v3721_v28  ;;  %v4608_v63 = vld [vmem:[#allocation2 + $0x52c] sm:$0xf0]  ;;  %v3545_v5 = vor.u32 %v4576_v61, %v3544_v59  ;;  %v3528_v6 = vld [vmem:[#allocation2 + $0x400] sm:$0xf]  ;;  %v3386_v16 = vld [vmem:[#allocation2 + $0x2f0] sm:$0xf0] }
  0x3d   :  { %1371 = vmatpush.bf16.msrb.mxu3 %v3085_v29  ;;  %v4572_v7 = vld [vmem:[#allocation2 + $0x40c] sm:$0xf0]  ;;  %v3656_v9 = vld [vmem:[#allocation2 + $0x500] sm:$0xf]  ;;  %v3673_v10 = vor.u32 %v4608_v63, %v3672_v62  ;;  %v4566_v17 = vld [vmem:[#allocation2 + $0x3e4] sm:$0xf]  ;;  %v3389_v31 = vor.u32 %v4534_v15, %v3386_v16 }
  0x3e   :  { %1384 = vmatpush.bf16.msra.mxu2 %v3229_v24  ;;  %v4604_v12 = vld [vmem:[#allocation2 + $0x50c] sm:$0xf0]  ;;  %v3514_v18 = vld [vmem:[#allocation2 + $0x3f0] sm:$0xf0]  ;;  %v4598_v19 = vld [vmem:[#allocation2 + $0x4e4] sm:$0xf]  ;;  %v3529_v22 = vor.u32 %v4572_v7, %v3528_v6 }
  0x3f   :  { %1330 = vmatpush.bf16.msrb.mxu0 %v3577_v39  ;;  %v3642_v20 = vld [vmem:[#allocation2 + $0x4f0] sm:$0xf0]  ;;  %v63_v23 = vld [vmem:[%s5161_s0 + $0x20] sm:$0xff]  ;;  %v70_v24 = vld [vmem:[%s5161_s0 + $0x58] sm:$0xff]  ;;  %v3657_v26 = vor.u32 %v4604_v12, %v3656_v9  ;;  %v3517_v32 = vor.u32 %v4566_v17, %v3514_v18 }
  0x40   :  { %1344 = vmatpush.bf16.msrb.mxu1 %v3705_v42  ;;  %3798 = vmatmul.msk.bf16.vlgmr.msrb.gmra.mxu2 %vm1266_vm0, %v4947_v50  ;;  %v4474_v25 = vld [vmem:[#allocation2 + $0x104] sm:$0xf]  ;;  %v3146_v28 = vld [vmem:[#allocation2 + $0x110] sm:$0xf0]  ;;  %v64_v29 = vld [vmem:[%s5161_s0 + $0x28] sm:$0xff]  ;;  %v3645_v36 = vor.u32 %v4598_v19, %v3642_v20  ;;  %v4963_v37 = vpack.c.bf16 %v70_v24, %v63_v23 }
  0x41   :  { %1372 = vmatpush.bf16.msrb.mxu3 %v3069_v43  ;;  %v71_v30 = vld [vmem:[%s5161_s0 + $0x60] sm:$0xff]  ;;  %v3770_v34 = vld [vmem:[#allocation2 + $0x5f0] sm:$0xf0]  ;;  %v3149_v41 = vor.u32 %v4474_v25, %v3146_v28 }
  0x42   :  { %1385 = vmatpush.bf16.msra.mxu2 %v3213_v38  ;;  %v4630_v33 = vld [vmem:[#allocation2 + $0x5e4] sm:$0xf]  ;;  %v3370_v38 = vld [vmem:[#allocation2 + $0x2d0] sm:$0xf0]  ;;  %v4965_v42 = vpack.c.bf16 %v71_v30, %v64_v29 }
  0x43   :  { %1331 = vmatpush.bf16.msrb.mxu0 %v3561_v52  ;;  %v4530_v35 = vld [vmem:[#allocation2 + $0x2c4] sm:$0xf]  ;;  %v3498_v40 = vld [vmem:[#allocation2 + $0x3d0] sm:$0xf0]  ;;  %v3773_v45 = vor.u32 %v4630_v33, %v3770_v34 }
  0x44   :  { %1345 = vmatpush.bf16.msrb.mxu1 %v3689_v57  ;;  %v4562_v39 = vld [vmem:[#allocation2 + $0x3c4] sm:$0xf]  ;;  %v3626_v44 = vld [vmem:[#allocation2 + $0x4d0] sm:$0xf0]  ;;  %v3373_v46 = vor.u32 %v4530_v35, %v3370_v38 }
  0x45   :  { %1373 = vmatpush.bf16.msrb.mxu3 %v3053_v58  ;;  %v4594_v43 = vld [vmem:[#allocation2 + $0x4c4] sm:$0xf]  ;;  %v3501_v47 = vor.u32 %v4562_v39, %v3498_v40  ;;  %v3754_v49 = vld [vmem:[#allocation2 + $0x5d0] sm:$0xf0] }
  0x46   :  { %1386 = vmatpush.bf16.msra.mxu2 %v3197_v51  ;;  %v4626_v48 = vld [vmem:[#allocation2 + $0x5c4] sm:$0xf]  ;;  %v3629_v52 = vor.u32 %v4594_v43, %v3626_v44  ;;  %v3354_v53 = vld [vmem:[#allocation2 + $0x2b0] sm:$0xf0] }
  0x47   :  { %1332 = vmatpush.bf16.msrb.mxu0 %v3545_v5  ;;  %v4526_v51 = vld [vmem:[#allocation2 + $0x2a4] sm:$0xf]  ;;  %v3482_v57 = vld [vmem:[#allocation2 + $0x3b0] sm:$0xf0]  ;;  %v3757_v61 = vor.u32 %v4626_v48, %v3754_v49 }
  0x48   :  { %1346 = vmatpush.bf16.msrb.mxu1 %v3673_v10  ;;  %v4558_v56 = vld [vmem:[#allocation2 + $0x3a4] sm:$0xf]  ;;  %v3610_v59 = vld [vmem:[#allocation2 + $0x4b0] sm:$0xf0]  ;;  %v3357_v62 = vor.u32 %v4526_v51, %v3354_v53 }
  0x49   :  { %1374 = vmatpush.bf16.msrb.mxu3 %v3037_v11  ;;  %v4590_v58 = vld [vmem:[#allocation2 + $0x4a4] sm:$0xf]  ;;  %v3485_v63 = vor.u32 %v4558_v56, %v3482_v57  ;;  %v3738_v1 = vld [vmem:[#allocation2 + $0x5b0] sm:$0xf0] }
  0x4a   :  { %1387 = vmatpush.bf16.msra.mxu2 %v3181_v4  ;;  %v4622_v0 = vld [vmem:[#allocation2 + $0x5a4] sm:$0xf]  ;;  %v3613_v3 = vor.u32 %v4590_v58, %v3610_v59  ;;  %v3338_v4 = vld [vmem:[#allocation2 + $0x290] sm:$0xf0] }
  0x4b   :  { %1333 = vmatpush.bf16.msrb.mxu0 %v3529_v22  ;;  %v4522_v2 = vld [vmem:[#allocation2 + $0x284] sm:$0xf]  ;;  %v3466_v6 = vld [vmem:[#allocation2 + $0x390] sm:$0xf0]  ;;  %v3741_v10 = vor.u32 %v4622_v0, %v3738_v1  ;;  %v3136_v0 = vld [vmem:[#allocation2 + $0xe8] sm:$0xf] }
  0x4c   :  { %1347 = vmatpush.bf16.msrb.mxu1 %v3657_v26  ;;  %v4554_v5 = vld [vmem:[#allocation2 + $0x384] sm:$0xf]  ;;  %v3594_v9 = vld [vmem:[#allocation2 + $0x490] sm:$0xf0]  ;;  %v3341_v11 = vor.u32 %v4522_v2, %v3338_v4  ;;  %v4473_v1 = vld [vmem:[#allocation2 + $0xf4] sm:$0xf0] }
  0x4d   :  { %1375 = vmatpush.bf16.msrb.mxu3 %v3021_v27  ;;  %v4586_v7 = vld [vmem:[#allocation2 + $0x484] sm:$0xf]  ;;  %v3469_v12 = vor.u32 %v4554_v5, %v3466_v6  ;;  %v3722_v14 = vld [vmem:[#allocation2 + $0x590] sm:$0xf0]  ;;  %v3392_v5 = vld [vmem:[#allocation2 + $0x2e8] sm:$0xf] }
  0x4e   :  { %1388 = vmatpush.bf16.msra.mxu2 %v3165_v21  ;;  %1334 = vmatmul.bf16.vlgmr.msrb.gmra.mxu0 %v4963_v37  ;;  %v4618_v13 = vld [vmem:[#allocation2 + $0x584] sm:$0xf]  ;;  %v3597_v16 = vor.u32 %v4586_v7, %v3594_v9  ;;  %v3322_v17 = vld [vmem:[#allocation2 + $0x270] sm:$0xf0]  ;;  %v4537_v6 = vld [vmem:[#allocation2 + $0x2f4] sm:$0xf0] }
  0x4f   :  { %1396 = vmatpush.bf16.msra.mxu0 %v3389_v31  ;;  %1348 = vmatmul.bf16.vlgmr.msrb.gmra.mxu1 %v4965_v42  ;;  %v4518_v15 = vld [vmem:[#allocation2 + $0x264] sm:$0xf]  ;;  %v3450_v19 = vld [vmem:[#allocation2 + $0x370] sm:$0xf0]  ;;  %v3725_v22 = vor.u32 %v4618_v13, %v3722_v14  ;;  %v3137_v13 = vor.u32 %v4473_v1, %v3136_v0  ;;  %v3520_v14 = vld [vmem:[#allocation2 + $0x3e8] sm:$0xf] }
  0x50   :  { %1410 = vmatpush.bf16.msra.mxu1 %v3517_v32  ;;  %1376 = vmatmul.bf16.vlgmr.msrb.gmra.mxu3 %v4925_v55  ;;  %v4550_v18 = vld [vmem:[#allocation2 + $0x364] sm:$0xf]  ;;  %v3578_v21 = vld [vmem:[#allocation2 + $0x470] sm:$0xf0]  ;;  %v3325_v23 = vor.u32 %v4518_v15, %v3322_v17  ;;  %v4569_v15 = vld [vmem:[#allocation2 + $0x3f4] sm:$0xf0] }
  0x51   :  { %1424 = vmatpush.bf16.msra.mxu3 %v3645_v36  ;;  %v4582_v20 = vld [vmem:[#allocation2 + $0x464] sm:$0xf]  ;;  %v3453_v24 = vor.u32 %v4550_v18, %v3450_v19  ;;  %v3706_v26 = vld [vmem:[#allocation2 + $0x570] sm:$0xf0]  ;;  %v3264_v17 = vld [vmem:[#allocation2 + $0x1e8] sm:$0xf]  ;;  %v3393_v19 = vor.u32 %v4537_v6, %v3392_v5 }
  0x52   :  { %1389 = vmatpush.bf16.msra.mxu2 %v3149_v41  ;;  %v4614_v25 = vld [vmem:[#allocation2 + $0x564] sm:$0xf]  ;;  %v3581_v28 = vor.u32 %v4582_v20, %v3578_v21  ;;  %v3306_v29 = vld [vmem:[#allocation2 + $0x250] sm:$0xf0]  ;;  %v4505_v18 = vld [vmem:[#allocation2 + $0x1f4] sm:$0xf0] }
  0x53   :  { %1397 = vmatpush.bf16.msra.mxu0 %v3373_v46  ;;  %v4514_v27 = vld [vmem:[#allocation2 + $0x244] sm:$0xf]  ;;  %v3434_v31 = vld [vmem:[#allocation2 + $0x350] sm:$0xf0]  ;;  %v3709_v34 = vor.u32 %v4614_v25, %v3706_v26  ;;  %v3120_v21 = vld [vmem:[#allocation2 + $0xc8] sm:$0xf]  ;;  %v3265_v26 = vor.u32 %v4505_v18, %v3264_v17 }
  0x54   :  { %1411 = vmatpush.bf16.msra.mxu1 %v3501_v47  ;;  %v4546_v30 = vld [vmem:[#allocation2 + $0x344] sm:$0xf]  ;;  %v3562_v33 = vld [vmem:[#allocation2 + $0x450] sm:$0xf0]  ;;  %v3309_v35 = vor.u32 %v4514_v27, %v3306_v29  ;;  %v4533_v25 = vld [vmem:[#allocation2 + $0x2d4] sm:$0xf0] }
  0x55   :  { %1425 = vmatpush.bf16.msra.mxu3 %v3629_v52  ;;  %1390 = vmatmul.bf16.vlgmr.msra.gmra.mxu2 %v4937_v8  ;;  %v4578_v32 = vld [vmem:[#allocation2 + $0x444] sm:$0xf]  ;;  %v3437_v36 = vor.u32 %v4546_v30, %v3434_v31  ;;  %v3690_v39 = vld [vmem:[#allocation2 + $0x550] sm:$0xf0]  ;;  %v3504_v27 = vld [vmem:[#allocation2 + $0x3c8] sm:$0xf] }
  0x56   :  { %1438 = vmatpush.bf16.msrb.mxu2 %v3773_v45  ;;  %v4610_v38 = vld [vmem:[#allocation2 + $0x544] sm:$0xf]  ;;  %v3565_v41 = vor.u32 %v4578_v32, %v3562_v33  ;;  %v3290_v43 = vld [vmem:[#allocation2 + $0x230] sm:$0xf0]  ;;  %v3248_v30 = vld [vmem:[#allocation2 + $0x1c8] sm:$0xf] }
  0x57   :  { %1398 = vmatpush.bf16.msra.mxu0 %v3357_v62  ;;  %v4510_v40 = vld [vmem:[#allocation2 + $0x224] sm:$0xf]  ;;  %v3418_v45 = vld [vmem:[#allocation2 + $0x330] sm:$0xf0]  ;;  %v3693_v48 = vor.u32 %v4610_v38, %v3690_v39  ;;  %v4501_v31 = vld [vmem:[#allocation2 + $0x1d4] sm:$0xf0] }
  0x58   :  { %1412 = vmatpush.bf16.msra.mxu1 %v3485_v63  ;;  %v4542_v44 = vld [vmem:[#allocation2 + $0x324] sm:$0xf]  ;;  %v3546_v47 = vld [vmem:[#allocation2 + $0x430] sm:$0xf0]  ;;  %v3293_v52 = vor.u32 %v4510_v40, %v3290_v43  ;;  %v3104_v33 = vld [vmem:[#allocation2 + $0xa8] sm:$0xf]  ;;  %v3249_v39 = vor.u32 %v4501_v31, %v3248_v30 }
  0x59   :  { %1426 = vmatpush.bf16.msra.mxu3 %v3613_v3  ;;  %v4574_v46 = vld [vmem:[#allocation2 + $0x424] sm:$0xf]  ;;  %v3674_v51 = vld [vmem:[#allocation2 + $0x530] sm:$0xf0]  ;;  %v3421_v53 = vor.u32 %v4542_v44, %v3418_v45  ;;  %v4529_v38 = vld [vmem:[#allocation2 + $0x2b4] sm:$0xf0] }
  0x5a   :  { %1439 = vmatpush.bf16.msrb.mxu2 %v3757_v61  ;;  %v4606_v49 = vld [vmem:[#allocation2 + $0x524] sm:$0xf]  ;;  %v3274_v57 = vld [vmem:[#allocation2 + $0x210] sm:$0xf0]  ;;  %v3549_v59 = vor.u32 %v4574_v46, %v3546_v47  ;;  %v3488_v40 = vld [vmem:[#allocation2 + $0x3a8] sm:$0xf] }
  0x5b   :  { %1399 = vmatpush.bf16.msra.mxu0 %v3341_v11  ;;  %v4506_v56 = vld [vmem:[#allocation2 + $0x204] sm:$0xf]  ;;  %v3402_v61 = vld [vmem:[#allocation2 + $0x310] sm:$0xf0]  ;;  %v3677_v3 = vor.u32 %v4606_v49, %v3674_v51  ;;  %v3232_v44 = vld [vmem:[#allocation2 + $0x1a8] sm:$0xf] }
  0x5c   :  { %1413 = vmatpush.bf16.msra.mxu1 %v3469_v12  ;;  %v4538_v58 = vld [vmem:[#allocation2 + $0x304] sm:$0xf]  ;;  %v3530_v63 = vld [vmem:[#allocation2 + $0x410] sm:$0xf0]  ;;  %v3277_v7 = vor.u32 %v4506_v56, %v3274_v57  ;;  %v4497_v45 = vld [vmem:[#allocation2 + $0x1b4] sm:$0xf0] }
  0x5d   :  { %1427 = vmatpush.bf16.msra.mxu3 %v3597_v16  ;;  %v4570_v62 = vld [vmem:[#allocation2 + $0x404] sm:$0xf]  ;;  %v3786_v4 = vld [vmem:[#allocation2 + $0x610] sm:$0xf0]  ;;  %v3405_v9 = vor.u32 %v4538_v58, %v3402_v61  ;;  %v3088_v47 = vld [vmem:[#allocation2 + $0x88] sm:$0xf] }
  0x5e   :  { %1440 = vmatpush.bf16.msrb.mxu2 %v3741_v10  ;;  %v4634_v2 = vld [vmem:[#allocation2 + $0x604] sm:$0xf]  ;;  %v3658_v11 = vld [vmem:[#allocation2 + $0x510] sm:$0xf0]  ;;  %v3533_v12 = vor.u32 %v4570_v62, %v3530_v63  ;;  %v3344_v51 = vld [vmem:[#allocation2 + $0x288] sm:$0xf] }
  0x5f   :  { %1400 = vmatpush.bf16.msra.mxu0 %v3325_v23  ;;  %v4602_v10 = vld [vmem:[#allocation2 + $0x504] sm:$0xf]  ;;  %v3789_v16 = vor.u32 %v4634_v2, %v3786_v4  ;;  %v3521_v23 = vor.u32 %v4569_v15, %v3520_v14  ;;  %v3472_v56 = vld [vmem:[#allocation2 + $0x388] sm:$0xf]  ;;  %v4557_v57 = vld [vmem:[#allocation2 + $0x394] sm:$0xf0] }
  0x60   :  { %1414 = vmatpush.bf16.msra.mxu1 %v3453_v24  ;;  %v3661_v20 = vor.u32 %v4602_v10, %v3658_v11  ;;  %v3376_v24 = vld [vmem:[#allocation2 + $0x2c8] sm:$0xf]  ;;  %v4493_v61 = vld [vmem:[#allocation2 + $0x194] sm:$0xf0]  ;;  %v3473_v1 = vor.u32 %v4557_v57, %v3472_v56  ;;  %v4471_v56 = vld [vmem:[#allocation2 + $0xec] sm:$0xf] }
  0x61   :  { %1428 = vmatpush.bf16.msra.mxu3 %v3581_v28  ;;  %v4565_v28 = vld [vmem:[#allocation2 + $0x3d4] sm:$0xf0]  ;;  %v3377_v32 = vor.u32 %v4533_v25, %v3376_v24  ;;  %v3072_v63 = vld [vmem:[#allocation2 + $0x68] sm:$0xf]  ;;  %v3138_v57 = vld [vmem:[#allocation2 + $0xf8] sm:$0xf0] }
  0x62   :  { %1441 = vmatpush.bf16.msrb.mxu2 %v3725_v22  ;;  %v4469_v22 = vld [vmem:[#allocation2 + $0xd4] sm:$0xf0]  ;;  %v3328_v2 = vld [vmem:[#allocation2 + $0x268] sm:$0xf] }
  0x63   :  { %1401 = vmatpush.bf16.msra.mxu0 %v3309_v35  ;;  %v3121_v29 = vor.u32 %v4469_v22, %v3120_v21  ;;  %v3505_v35 = vor.u32 %v4565_v28, %v3504_v27  ;;  %v4457_v0 = vld [vmem:[#allocation2 + $0x74] sm:$0xf0]  ;;  %v3456_v5 = vld [vmem:[#allocation2 + $0x368] sm:$0xf] }
  0x64   :  { %1415 = vmatpush.bf16.msra.mxu1 %v3437_v36  ;;  %v3360_v36 = vld [vmem:[#allocation2 + $0x2a8] sm:$0xf]  ;;  %v4553_v6 = vld [vmem:[#allocation2 + $0x374] sm:$0xf0] }
  0x65   :  { %1429 = vmatpush.bf16.msra.mxu3 %v3565_v41  ;;  %v4561_v41 = vld [vmem:[#allocation2 + $0x3b4] sm:$0xf0]  ;;  %v3361_v46 = vor.u32 %v4529_v38, %v3360_v36  ;;  %v3457_v14 = vor.u32 %v4553_v6, %v3456_v5  ;;  %v3312_v15 = vld [vmem:[#allocation2 + $0x248] sm:$0xf]  ;;  %v3141_v6 = vor.u32 %v4471_v56, %v3138_v57 }
  0x66   :  { %1442 = vmatpush.bf16.msrb.mxu2 %v3709_v34  ;;  %v4465_v34 = vld [vmem:[#allocation2 + $0xb4] sm:$0xf0]  ;;  %v3489_v49 = vor.u32 %v4561_v41, %v3488_v40  ;;  %v3440_v18 = vld [vmem:[#allocation2 + $0x348] sm:$0xf] }
  0x67   :  { %1402 = vmatpush.bf16.msra.mxu0 %v3293_v52  ;;  %v3105_v43 = vor.u32 %v4465_v34, %v3104_v33  ;;  %v4525_v52 = vld [vmem:[#allocation2 + $0x294] sm:$0xf0]  ;;  %v3184_v21 = vld [vmem:[#allocation2 + $0x148] sm:$0xf] }
  0x68   :  { %1416 = vmatpush.bf16.msra.mxu1 %v3421_v53  ;;  %v3233_v53 = vor.u32 %v4497_v45, %v3232_v44  ;;  %v3345_v62 = vor.u32 %v4525_v52, %v3344_v51  ;;  %v4489_v10 = vld [vmem:[#allocation2 + $0x174] sm:$0xf0]  ;;  %v3040_v24 = vld [vmem:[#allocation2 + $0x28] sm:$0xf] }
  0x69   :  { %1430 = vmatpush.bf16.msra.mxu3 %v3549_v59  ;;  %v3216_v59 = vld [vmem:[#allocation2 + $0x188] sm:$0xf]  ;;  %v4485_v22 = vld [vmem:[#allocation2 + $0x154] sm:$0xf0] }
  0x6a   :  { %1443 = vmatpush.bf16.msrb.mxu2 %v3693_v48  ;;  %v4461_v48 = vld [vmem:[#allocation2 + $0x94] sm:$0xf0]  ;;  %v3217_v4 = vor.u32 %v4493_v61, %v3216_v59  ;;  %v3296_v27 = vld [vmem:[#allocation2 + $0x228] sm:$0xf] }
  0x6b   :  { %1403 = vmatpush.bf16.msra.mxu0 %v3277_v7  ;;  %v3089_v58 = vor.u32 %v4461_v48, %v3088_v47  ;;  %v3073_v7 = vor.u32 %v4457_v0, %v3072_v63  ;;  %v4449_v25 = vld [vmem:[#allocation2 + $0x34] sm:$0xf0]  ;;  %v3424_v30 = vld [vmem:[#allocation2 + $0x328] sm:$0xf] }
  0x6c   :  { %1417 = vmatpush.bf16.msra.mxu1 %v3405_v9  ;;  %v3200_v9 = vld [vmem:[#allocation2 + $0x168] sm:$0xf]  ;;  %v4513_v28 = vld [vmem:[#allocation2 + $0x234] sm:$0xf0] }
  0x6d   :  { %1431 = vmatpush.bf16.msra.mxu3 %v3533_v12  ;;  %v3056_v12 = vld [vmem:[#allocation2 + $0x48] sm:$0xf]  ;;  %v3201_v17 = vor.u32 %v4489_v10, %v3200_v9  ;;  %v4545_v31 = vld [vmem:[#allocation2 + $0x334] sm:$0xf0]  ;;  %v3297_v36 = vor.u32 %v4513_v28, %v3296_v27  ;;  %v4467_v9 = vld [vmem:[#allocation2 + $0xcc] sm:$0xf] }
  0x6e   :  { %1444 = vmatpush.bf16.msrb.mxu2 %v3677_v3  ;;  %1404 = vmatmul.bf16.vlgmr.msra.gmra.mxu0 %v4923_v54  ;;  %v4521_v3 = vld [vmem:[#allocation2 + $0x274] sm:$0xf0]  ;;  %v3168_v33 = vld [vmem:[#allocation2 + $0x128] sm:$0xf]  ;;  %v3425_v41 = vor.u32 %v4545_v31, %v3424_v30  ;;  %v3122_v10 = vld [vmem:[#allocation2 + $0xd8] sm:$0xf0] }
  0x6f   :  { %1494 = vmatpush.bf16.msrb.mxu0 %v3393_v19  ;;  %1418 = vmatmul.bf16.vlgmr.msra.gmra.mxu1 %v4927_v60  ;;  %v3329_v11 = vor.u32 %v4521_v3, %v3328_v2  ;;  %v4549_v19 = vld [vmem:[#allocation2 + $0x354] sm:$0xf0]  ;;  %v3280_v44 = vld [vmem:[#allocation2 + $0x208] sm:$0xf]  ;;  %v4503_v3 = vld [vmem:[#allocation2 + $0x1ec] sm:$0xf] }
  0x70   :  { %1466 = vmatpush.bf16.msrb.mxu1 %v3137_v13  ;;  %1432 = vmatmul.bf16.vlgmr.msra.gmra.mxu3 %v4963_v37  ;;  %v4453_v13 = vld [vmem:[#allocation2 + $0x54] sm:$0xf0]  ;;  %v3776_v61 = vld [vmem:[#allocation2 + $0x5e8] sm:$0xf]  ;;  %v3234_v30 = vld [vmem:[#allocation2 + $0x1b8] sm:$0xf0] }
  0x71   :  { %1459 = vmatpush.bf16.msrb.mxu3 %v3789_v16  ;;  %v4517_v16 = vld [vmem:[#allocation2 + $0x254] sm:$0xf0]  ;;  %v3632_v63 = vld [vmem:[#allocation2 + $0x4c8] sm:$0xf] }
  0x72   :  { %1445 = vmatpush.bf16.msrb.mxu2 %v3661_v20  ;;  %v3057_v20 = vor.u32 %v4453_v13, %v3056_v12  ;;  %v4481_v34 = vld [vmem:[#allocation2 + $0x134] sm:$0xf0]  ;;  %v3760_v13 = vld [vmem:[#allocation2 + $0x5c8] sm:$0xf] }
  0x73   :  { %1495 = vmatpush.bf16.msrb.mxu0 %v3377_v32  ;;  %v3041_v32 = vor.u32 %v4449_v25, %v3040_v24  ;;  %v4445_v38 = vld [vmem:[#allocation2 + $0x14] sm:$0xf0]  ;;  %v3169_v47 = vor.u32 %v4481_v34, %v3168_v33  ;;  %v3744_v25 = vld [vmem:[#allocation2 + $0x5a8] sm:$0xf]  ;;  %v4459_v33 = vld [vmem:[#allocation2 + $0x8c] sm:$0xf] }
  0x74   :  { %1467 = vmatpush.bf16.msrb.mxu1 %v3121_v29  ;;  %v3185_v29 = vor.u32 %v4485_v22, %v3184_v21  ;;  %v4601_v40 = vld [vmem:[#allocation2 + $0x4f4] sm:$0xf0]  ;;  %v4463_v21 = vld [vmem:[#allocation2 + $0xac] sm:$0xf]  ;;  %v3106_v22 = vld [vmem:[#allocation2 + $0xb8] sm:$0xf0] }
  0x75   :  { %1480 = vmatpush.bf16.msra.mxu3 %v3265_v26  ;;  %1446 = vmatmul.bf16.vlgmr.msrb.gmra.mxu2 %v4965_v42  ;;  %v3441_v26 = vor.u32 %v4549_v19, %v3440_v18  ;;  %v4509_v45 = vld [vmem:[#allocation2 + $0x214] sm:$0xf0]  ;;  %v3250_v18 = vld [vmem:[#allocation2 + $0x1d8] sm:$0xf0]  ;;  %v3125_v19 = vor.u32 %v4467_v9, %v3122_v10  ;;  %v3600_v27 = vld [vmem:[#allocation2 + $0x488] sm:$0xf]  ;;  %v3109_v31 = vor.u32 %v4463_v21, %v3106_v22 }
  0x76   :  { %1508 = vmatpush.bf16.msra.mxu2 %v3521_v23  ;;  %v3313_v23 = vor.u32 %v4517_v16, %v3312_v15  ;;  %v4541_v48 = vld [vmem:[#allocation2 + $0x314] sm:$0xf0]  ;;  %v3281_v59 = vor.u32 %v4509_v45, %v3280_v44  ;;  %v3616_v15 = vld [vmem:[#allocation2 + $0x4a8] sm:$0xf]  ;;  %v3090_v34 = vld [vmem:[#allocation2 + $0x98] sm:$0xf0] }
  0x77   :  { %1496 = vmatpush.bf16.msrb.mxu0 %v3361_v46  ;;  %v3408_v46 = vld [vmem:[#allocation2 + $0x308] sm:$0xf]  ;;  %v4637_v51 = vld [vmem:[#allocation2 + $0x614] sm:$0xf0]  ;;  %v3218_v44 = vld [vmem:[#allocation2 + $0x198] sm:$0xf0]  ;;  %v3093_v45 = vor.u32 %v4459_v33, %v3090_v34 }
  0x78   :  { %1468 = vmatpush.bf16.msrb.mxu1 %v3105_v43  ;;  %v3152_v43 = vld [vmem:[#allocation2 + $0x108] sm:$0xf]  ;;  %v3409_v0 = vor.u32 %v4541_v48, %v3408_v46  ;;  %v4593_v16 = vld [vmem:[#allocation2 + $0x4b4] sm:$0xf0]  ;;  %v3074_v48 = vld [vmem:[#allocation2 + $0x78] sm:$0xf0] }
  0x79   :  { %1481 = vmatpush.bf16.msra.mxu3 %v3249_v39  ;;  %v3648_v39 = vld [vmem:[#allocation2 + $0x4e8] sm:$0xf]  ;;  %v4589_v28 = vld [vmem:[#allocation2 + $0x494] sm:$0xf0]  ;;  %v3186_v9 = vld [vmem:[#allocation2 + $0x158] sm:$0xf0] }
  0x7a   :  { %1509 = vmatpush.bf16.msra.mxu2 %v3505_v35  ;;  %v3024_v35 = vld [vmem:[#allocation2 + $0x8] sm:$0xf]  ;;  %v4581_v57 = vld [vmem:[#allocation2 + $0x454] sm:$0xf0]  ;;  %v3170_v21 = vld [vmem:[#allocation2 + $0x138] sm:$0xf0] }
  0x7b   :  { %1497 = vmatpush.bf16.msrb.mxu0 %v3345_v62  ;;  %v3025_v52 = vor.u32 %v4445_v38, %v3024_v35  ;;  %v4633_v62 = vld [vmem:[#allocation2 + $0x5f4] sm:$0xf0]  ;;  %v3601_v35 = vor.u32 %v4589_v28, %v3600_v27  ;;  %v3728_v38 = vld [vmem:[#allocation2 + $0x588] sm:$0xf]  ;;  %v4443_v27 = vld [vmem:[#allocation2 + $0xc] sm:$0xf] }
  0x7c   :  { %1469 = vmatpush.bf16.msrb.mxu1 %v3089_v58  ;;  %v3649_v58 = vor.u32 %v4601_v40, %v3648_v39  ;;  %v4621_v39 = vld [vmem:[#allocation2 + $0x594] sm:$0xf0]  ;;  %v3584_v40 = vld [vmem:[#allocation2 + $0x468] sm:$0xf]  ;;  %v3026_v28 = vld [vmem:[#allocation2 + $0x18] sm:$0xf0] }
  0x7d   :  { %1482 = vmatpush.bf16.msra.mxu3 %v3233_v53  ;;  %v4477_v53 = vld [vmem:[#allocation2 + $0x114] sm:$0xf0]  ;;  %v3729_v46 = vor.u32 %v4621_v39, %v3728_v38  ;;  %v3568_v56 = vld [vmem:[#allocation2 + $0x448] sm:$0xf]  ;;  %v3522_v33 = vld [vmem:[#allocation2 + $0x3f8] sm:$0xf0]  ;;  %v3029_v39 = vor.u32 %v4443_v27, %v3026_v28 }
  0x7e   :  { %1510 = vmatpush.bf16.msra.mxu2 %v3489_v49  ;;  %v3792_v49 = vld [vmem:[#allocation2 + $0x608] sm:$0xf]  ;;  %v3153_v5 = vor.u32 %v4477_v53, %v3152_v43  ;;  %v4491_v43 = vld [vmem:[#allocation2 + $0x18c] sm:$0xf]  ;;  %v4617_v53 = vld [vmem:[#allocation2 + $0x574] sm:$0xf0] }
  0x7f   :  { %1498 = vmatpush.bf16.msrb.mxu0 %v3329_v11  ;;  %v3793_v2 = vor.u32 %v4637_v51, %v3792_v49  ;;  %v3221_v51 = vor.u32 %v4491_v43, %v3218_v44  ;;  %v4531_v38 = vld [vmem:[#allocation2 + $0x2cc] sm:$0xf]  ;;  %v3154_v43 = vld [vmem:[#allocation2 + $0x118] sm:$0xf0] }
  0x80   :  { %1470 = vmatpush.bf16.msrb.mxu1 %v3073_v7  ;;  %3799 = vmatmul.msk.bf16.vlgmr.msrb.gmra.mxu3 %vm1266_vm0, %v4947_v50  ;;  %v3777_v7 = vor.u32 %v4633_v62, %v3776_v61  ;;  %v3458_v28 = vld [vmem:[#allocation2 + $0x378] sm:$0xf0] }
  0x81   :  { %1483 = vmatpush.bf16.msra.mxu3 %v3217_v4  ;;  %v3266_v4 = vld [vmem:[#allocation2 + $0x1f8] sm:$0xf0] }
  0x82   :  { %1511 = vmatpush.bf16.msra.mxu2 %v3473_v1  ;;  %v4597_v1 = vld [vmem:[#allocation2 + $0x4d4] sm:$0xf0]  ;;  %v3269_v12 = vor.u32 %v4503_v3, %v3266_v4  ;;  %v3696_v3 = vld [vmem:[#allocation2 + $0x548] sm:$0xf] }
  0x83   :  { %1499 = vmatpush.bf16.msrb.mxu0 %v3313_v23  ;;  %v3633_v11 = vor.u32 %v4597_v1, %v3632_v63  ;;  %v3617_v23 = vor.u32 %v4593_v16, %v3616_v15  ;;  %v4451_v63 = vld [vmem:[#allocation2 + $0x4c] sm:$0xf]  ;;  %v3569_v1 = vor.u32 %v4581_v57, %v3568_v56  ;;  %v4613_v4 = vld [vmem:[#allocation2 + $0x554] sm:$0xf0]  ;;  %v3680_v16 = vld [vmem:[#allocation2 + $0x528] sm:$0xf] }
  0x84   :  { %1471 = vmatpush.bf16.msrb.mxu1 %v3057_v20  ;;  %v4595_v56 = vld [vmem:[#allocation2 + $0x4cc] sm:$0xf]  ;;  %v3634_v57 = vld [vmem:[#allocation2 + $0x4d8] sm:$0xf0] }
  0x85   :  { %1484 = vmatpush.bf16.msra.mxu3 %v3201_v17  ;;  %v4499_v17 = vld [vmem:[#allocation2 + $0x1cc] sm:$0xf] }
  0x86   :  { %1512 = vmatpush.bf16.msra.mxu2 %v3457_v14  ;;  %v4629_v14 = vld [vmem:[#allocation2 + $0x5d4] sm:$0xf0]  ;;  %v3253_v24 = vor.u32 %v4499_v17, %v3250_v18  ;;  %v3536_v18 = vld [vmem:[#allocation2 + $0x408] sm:$0xf] }
  0x87   :  { %1500 = vmatpush.bf16.msrb.mxu0 %v3297_v36  ;;  %v3761_v20 = vor.u32 %v4629_v14, %v3760_v13  ;;  %v3042_v13 = vld [vmem:[#allocation2 + $0x38] sm:$0xf0]  ;;  %v4609_v17 = vld [vmem:[#allocation2 + $0x534] sm:$0xf0] }
  0x88   :  { %1472 = vmatpush.bf16.msrb.mxu1 %v3041_v32 }
  0x89   :  { %1485 = vmatpush.bf16.msra.mxu3 %v3185_v29  ;;  %v4495_v29 = vld [vmem:[#allocation2 + $0x1ac] sm:$0xf] }
  0x8a   :  { %1513 = vmatpush.bf16.msra.mxu2 %v3441_v26  ;;  %v4625_v26 = vld [vmem:[#allocation2 + $0x5b4] sm:$0xf0]  ;;  %v3237_v36 = vor.u32 %v4495_v29, %v3234_v30 }
  0x8b   :  { %1501 = vmatpush.bf16.msrb.mxu0 %v3281_v59  ;;  %v3745_v32 = vor.u32 %v4625_v26, %v3744_v25  ;;  %v3202_v59 = vld [vmem:[#allocation2 + $0x178] sm:$0xf0]  ;;  %v3681_v25 = vor.u32 %v4609_v17, %v3680_v16  ;;  %v3664_v26 = vld [vmem:[#allocation2 + $0x508] sm:$0xf] }
  0x8c   :  { %1473 = vmatpush.bf16.msrb.mxu1 %v3025_v52  ;;  %v3712_v52 = vld [vmem:[#allocation2 + $0x568] sm:$0xf]  ;;  %v3474_v17 = vld [vmem:[#allocation2 + $0x398] sm:$0xf0] }
  0x8d   :  { %1486 = vmatpush.bf16.msra.mxu3 %v3169_v47  ;;  %v4455_v47 = vld [vmem:[#allocation2 + $0x6c] sm:$0xf]  ;;  %v3713_v62 = vor.u32 %v4617_v53, %v3712_v52  ;;  %v3506_v53 = vld [vmem:[#allocation2 + $0x3d8] sm:$0xf0] }
  0x8e   :  { %1514 = vmatpush.bf16.msra.mxu2 %v3425_v41  ;;  %1502 = vmatmul.bf16.vlgmr.msrb.gmra.mxu0 %v4923_v54  ;;  %v4585_v41 = vld [vmem:[#allocation2 + $0x474] sm:$0xf0]  ;;  %v3077_v61 = vor.u32 %v4455_v47, %v3074_v48 }
  0x8f   :  { %1557 = vmatpush.bf16.msra.mxu0 %v3793_v2  ;;  %1474 = vmatmul.bf16.vlgmr.msrb.gmra.mxu1 %v4925_v55  ;;  %v3585_v49 = vor.u32 %v4585_v41, %v3584_v40  ;;  %v3378_v40 = vld [vmem:[#allocation2 + $0x2d8] sm:$0xf0]  ;;  %v4475_v41 = vld [vmem:[#allocation2 + $0x10c] sm:$0xf] }
  0x90   :  { %1522 = vmatpush.bf16.msra.mxu1 %v3649_v58  ;;  %v4487_v58 = vld [vmem:[#allocation2 + $0x16c] sm:$0xf]  ;;  %v3157_v52 = vor.u32 %v4475_v41, %v3154_v43  ;;  %v3570_v43 = vld [vmem:[#allocation2 + $0x458] sm:$0xf0] }
  0x91   :  { %1487 = vmatpush.bf16.msra.mxu3 %v3153_v5  ;;  %v3205_v2 = vor.u32 %v4487_v58, %v3202_v59  ;;  %v3552_v5 = vld [vmem:[#allocation2 + $0x428] sm:$0xf]  ;;  %v4527_v59 = vld [vmem:[#allocation2 + $0x2ac] sm:$0xf] }
  0x92   :  { %1515 = vmatpush.bf16.msra.mxu2 %v3409_v0  ;;  %v3058_v0 = vld [vmem:[#allocation2 + $0x58] sm:$0xf0]  ;;  %v4579_v41 = vld [vmem:[#allocation2 + $0x44c] sm:$0xf] }
  0x93   :  { %1578 = vmatpush.bf16.msrb.mxu0 %v3269_v12  ;;  %v3061_v10 = vor.u32 %v4451_v63, %v3058_v0  ;;  %v4447_v12 = vld [vmem:[#allocation2 + $0x2c] sm:$0xf]  ;;  %v3762_v63 = vld [vmem:[#allocation2 + $0x5d8] sm:$0xf0] }
  0x94   :  { %1523 = vmatpush.bf16.msra.mxu1 %v3633_v11  ;;  %1488 = vmatmul.bf16.vlgmr.msra.gmra.mxu3 %v4937_v8  ;;  %v3697_v11 = vor.u32 %v4613_v4, %v3696_v3  ;;  %v3045_v22 = vor.u32 %v4447_v12, %v3042_v13  ;;  %v3490_v4 = vld [vmem:[#allocation2 + $0x3b8] sm:$0xf0] }
  0x95   :  { %1536 = vmatpush.bf16.msrb.mxu3 %v3777_v7  ;;  %1516 = vmatmul.bf16.vlgmr.msra.gmra.mxu2 %v4927_v60  ;;  %v4483_v7 = vld [vmem:[#allocation2 + $0x14c] sm:$0xf]  ;;  %v3746_v12 = vld [vmem:[#allocation2 + $0x5b8] sm:$0xf0] }
  0x96   :  { %1564 = vmatpush.bf16.msrb.mxu2 %v3141_v6  ;;  %v4577_v6 = vld [vmem:[#allocation2 + $0x434] sm:$0xf0]  ;;  %v3189_v15 = vor.u32 %v4483_v7, %v3186_v9  ;;  %v4523_v9 = vld [vmem:[#allocation2 + $0x28c] sm:$0xf] }
  0x97   :  { %1579 = vmatpush.bf16.msrb.mxu0 %v3253_v24  ;;  %v3553_v14 = vor.u32 %v4577_v6, %v3552_v5  ;;  %v3394_v24 = vld [vmem:[#allocation2 + $0x2f8] sm:$0xf0]  ;;  %v4591_v5 = vld [vmem:[#allocation2 + $0x4ac] sm:$0xf] }
  0x98   :  { %1524 = vmatpush.bf16.msra.mxu1 %v3617_v23  ;;  %v4535_v23 = vld [vmem:[#allocation2 + $0x2ec] sm:$0xf]  ;;  %v3618_v6 = vld [vmem:[#allocation2 + $0x4b8] sm:$0xf0] }
  0x99   :  { %1537 = vmatpush.bf16.msrb.mxu3 %v3761_v20  ;;  %v4479_v20 = vld [vmem:[#allocation2 + $0x12c] sm:$0xf]  ;;  %v3397_v34 = vor.u32 %v4535_v23, %v3394_v24 }
  0x9a   :  { %1565 = vmatpush.bf16.msrb.mxu2 %v3125_v19  ;;  %v4573_v19 = vld [vmem:[#allocation2 + $0x414] sm:$0xf0]  ;;  %v3173_v30 = vor.u32 %v4479_v20, %v3170_v21  ;;  %v4519_v21 = vld [vmem:[#allocation2 + $0x26c] sm:$0xf] }
  0x9b   :  { %1580 = vmatpush.bf16.msrb.mxu0 %v3237_v36  ;;  %v3537_v29 = vor.u32 %v4573_v19, %v3536_v18  ;;  %v3650_v36 = vld [vmem:[#allocation2 + $0x4f8] sm:$0xf0]  ;;  %v4587_v18 = vld [vmem:[#allocation2 + $0x48c] sm:$0xf] }
  0x9c   :  { %1525 = vmatpush.bf16.msra.mxu1 %v3601_v35  ;;  %v4599_v35 = vld [vmem:[#allocation2 + $0x4ec] sm:$0xf]  ;;  %v3602_v19 = vld [vmem:[#allocation2 + $0x498] sm:$0xf0] }
  0x9d   :  { %1538 = vmatpush.bf16.msrb.mxu3 %v3745_v32  ;;  %v4567_v32 = vld [vmem:[#allocation2 + $0x3ec] sm:$0xf]  ;;  %v3653_v48 = vor.u32 %v4599_v35, %v3650_v36 }
  0x9e   :  { %1566 = vmatpush.bf16.msrb.mxu2 %v3109_v31  ;;  %3800 = vmatmul.msk.bf16.vlgmr.msra.gmra.mxu0 %vm1266_vm0, %v4947_v50  ;;  %v4605_v31 = vld [vmem:[#allocation2 + $0x514] sm:$0xf0]  ;;  %v3525_v47 = vor.u32 %v4567_v32, %v3522_v33  ;;  %v4619_v23 = vld [vmem:[#allocation2 + $0x58c] sm:$0xf] }
  0x9f   :  { %1581 = vmatpush.bf16.msrb.mxu0 %v3221_v51  ;;  %v3665_v44 = vor.u32 %v4605_v31, %v3664_v26  ;;  %v3381_v51 = vor.u32 %v4531_v38, %v3378_v40  ;;  %v4551_v26 = vld [vmem:[#allocation2 + $0x36c] sm:$0xf]  ;;  %v3442_v40 = vld [vmem:[#allocation2 + $0x358] sm:$0xf0] }
  0xa0   :  { %1526 = vmatpush.bf16.msra.mxu1 %v3585_v49  ;;  %v4563_v49 = vld [vmem:[#allocation2 + $0x3cc] sm:$0xf]  ;;  %v3461_v35 = vor.u32 %v4551_v26, %v3458_v28  ;;  %v4664_v28 = vld [vmem:[#allocation4 + $0xcc] sm:$0xf0] }
  0xa1   :  { %1539 = vmatpush.bf16.msrb.mxu3 %v3729_v46  ;;  %v3778_v46 = vld [vmem:[#allocation2 + $0x5f8] sm:$0xf0]  ;;  %v3509_v0 = vor.u32 %v4563_v49, %v3506_v53  ;;  %v4515_v32 = vld [vmem:[#allocation2 + $0x24c] sm:$0xf] }
  0xa2   :  { %1567 = vmatpush.bf16.msrb.mxu2 %v3093_v45  ;;  %v4631_v45 = vld [vmem:[#allocation2 + $0x5ec] sm:$0xf] }
  0xa3   :  { %1582 = vmatpush.bf16.msrb.mxu0 %v3205_v2  ;;  %v3781_v58 = vor.u32 %v4631_v45, %v3778_v46  ;;  %v4559_v2 = vld [vmem:[#allocation2 + $0x3ac] sm:$0xf]  ;;  %v3298_v46 = vld [vmem:[#allocation2 + $0x238] sm:$0xf0] }
  0xa4   :  { %1527 = vmatpush.bf16.msra.mxu1 %v3569_v1  ;;  %v3637_v1 = vor.u32 %v4595_v56, %v3634_v57  ;;  %v3493_v13 = vor.u32 %v4559_v2, %v3490_v4  ;;  %v4615_v33 = vld [vmem:[#allocation2 + $0x56c] sm:$0xf]  ;;  %v3426_v57 = vld [vmem:[#allocation2 + $0x338] sm:$0xf0] }
  0xa5   :  { %1540 = vmatpush.bf16.msrb.mxu3 %v3713_v62  ;;  %v4627_v62 = vld [vmem:[#allocation2 + $0x5cc] sm:$0xf]  ;;  %v3682_v2 = vld [vmem:[#allocation2 + $0x538] sm:$0xf0] }
  0xa6   :  { %1568 = vmatpush.bf16.msrb.mxu2 %v3077_v61  ;;  %v3362_v61 = vld [vmem:[#allocation2 + $0x2b8] sm:$0xf0]  ;;  %v3765_v7 = vor.u32 %v4627_v62, %v3762_v63  ;;  %v4547_v38 = vld [vmem:[#allocation2 + $0x34c] sm:$0xf] }
  0xa7   :  { %1583 = vmatpush.bf16.msrb.mxu0 %v3189_v15  ;;  %v3365_v3 = vor.u32 %v4527_v59, %v3362_v61  ;;  %v4555_v15 = vld [vmem:[#allocation2 + $0x38c] sm:$0xf]  ;;  %v3445_v49 = vor.u32 %v4547_v38, %v3442_v40  ;;  %v3554_v59 = vld [vmem:[#allocation2 + $0x438] sm:$0xf0]  ;;  %v3884_v38 = vld [vmem:[#allocation4 + $0xa0] sm:$0xf] }
  0xa8   :  { %1528 = vmatpush.bf16.msra.mxu1 %v3553_v14  ;;  %v3621_v14 = vor.u32 %v4591_v5, %v3618_v6  ;;  %v3477_v24 = vor.u32 %v4555_v15, %v3474_v17  ;;  %v4511_v45 = vld [vmem:[#allocation2 + $0x22c] sm:$0xf]  ;;  %v3794_v4 = vld [vmem:[#allocation2 + $0x618] sm:$0xf0]  ;;  %v4668_v17 = vld [vmem:[#allocation4 + $0xec] sm:$0xf0] }
  0xa9   :  { %1541 = vmatpush.bf16.msrb.mxu3 %v3697_v11  ;;  %v4623_v11 = vld [vmem:[#allocation2 + $0x5ac] sm:$0xf]  ;;  %v3301_v56 = vor.u32 %v4511_v45, %v3298_v46 }
  0xaa   :  { %1569 = vmatpush.bf16.msrb.mxu2 %v3061_v10  ;;  %v3346_v10 = vld [vmem:[#allocation2 + $0x298] sm:$0xf0]  ;;  %v3749_v20 = vor.u32 %v4623_v11, %v3746_v12  ;;  %v4507_v63 = vld [vmem:[#allocation2 + $0x20c] sm:$0xf] }
  0xab   :  { %1584 = vmatpush.bf16.msrb.mxu0 %v3173_v30  ;;  %v3349_v16 = vor.u32 %v4523_v9, %v3346_v10  ;;  %v3586_v30 = vld [vmem:[#allocation2 + $0x478] sm:$0xf0]  ;;  %v4992_v9 = vld [vmem:[%s5163_s2] sm:$0xf] }
  0xac   :  { %1529 = vmatpush.bf16.msra.mxu1 %v3537_v29  ;;  %v4583_v29 = vld [vmem:[#allocation2 + $0x46c] sm:$0xf]  ;;  %v3410_v12 = vld [vmem:[#allocation2 + $0x318] sm:$0xf0] }
  0xad   :  { %1542 = vmatpush.bf16.msrb.mxu3 %v3681_v25  ;;  %v3605_v25 = vor.u32 %v4587_v18, %v3602_v19  ;;  %v3589_v36 = vor.u32 %v4583_v29, %v3586_v30  ;;  %v4603_v18 = vld [vmem:[#allocation2 + $0x50c] sm:$0xf] }
  0xae   :  { %1570 = vmatpush.bf16.msrb.mxu2 %v3045_v22  ;;  %v3330_v22 = vld [vmem:[#allocation2 + $0x278] sm:$0xf0]  ;;  %v1279_v53 = vpop.f32.mrf.mxu0 }
  0xaf   :  { %1530 = vmatmul.bf16.vlgmr.msra.gmra.mxu1 %v4963_v37  ;;  %1585 = vmatpush.bf16.msrb.mxu0 %v3157_v52  ;;  %v3333_v27 = vor.u32 %v4519_v21, %v3330_v22  ;;  %v4543_v52 = vld [vmem:[#allocation2 + $0x32c] sm:$0xf]  ;;  %v4044_v21 = vld [vmem:[#allocation4 + $0x1e0] sm:$0xf]  ;;  %v4700_v22 = vld [vmem:[#allocation4 + $0x1ec] sm:$0xf0] }
  0xb0   :  { %1592 = vmatpush.bf16.msrb.mxu1 %v3397_v34  ;;  %v3714_v34 = vld [vmem:[#allocation2 + $0x578] sm:$0xf0]  ;;  %v3429_v5 = vor.u32 %v4543_v52, %v3426_v57  ;;  %v4045_v29 = vor.u32 %v4700_v22, %v4044_v21  ;;  %v3996_v52 = vld [vmem:[#allocation4 + $0x180] sm:$0xf]  ;;  %v4676_v21 = vld [vmem:[#allocation4 + $0x12c] sm:$0xf0] }
  0xb1   :  { %1543 = vmatpush.bf16.msrb.mxu3 %v3665_v44  ;;  %v3717_v44 = vor.u32 %v4615_v33, %v3714_v34 }
  0xb2   :  { %1571 = vmatpush.bf16.msrb.mxu2 %v3029_v39  ;;  %1586 = vmatmul.bf16.vlgmr.msrb.gmra.mxu0 %v4937_v8  ;;  %v3314_v8 = vld [vmem:[#allocation2 + $0x258] sm:$0xf0]  ;;  %v4987_v61 = vpop.f32.mrf.mxu1 }
  0xb3   :  { %1634 = vmatpush.bf16.msra.mxu0 %v3781_v58  ;;  %v3317_v39 = vor.u32 %v4515_v32, %v3314_v8  ;;  %v4575_v58 = vld [vmem:[#allocation2 + $0x42c] sm:$0xf]  ;;  %v4994_v10 = vpop.f32.mrf.mxu2  ;;  %v4696_v32 = vld [vmem:[#allocation4 + $0x1cc] sm:$0xf0] }
  0xb4   :  { %1593 = vmatpush.bf16.msrb.mxu1 %v3381_v51  ;;  %1544 = vmatmul.bf16.vlgmr.msrb.gmra.mxu3 %v4965_v42  ;;  %v3573_v51 = vor.u32 %v4579_v41, %v3570_v43  ;;  %v3557_v6 = vor.u32 %v4575_v58, %v3554_v59  ;;  %v4012_v43 = vld [vmem:[#allocation4 + $0x1a0] sm:$0xf]  ;;  %v4652_v59 = vld [vmem:[#allocation4 + $0x6c] sm:$0xf0] }
  0xb5   :  { %1606 = vmatpush.bf16.msra.mxu3 %v3525_v47  ;;  %1572 = vmatmul.bf16.vlgmr.msrb.gmra.mxu2 %v4925_v55  ;;  %v3730_v55 = vld [vmem:[#allocation2 + $0x598] sm:$0xf0]  ;;  %v4611_v47 = vld [vmem:[#allocation2 + $0x54c] sm:$0xf]  ;;  %v1321_v33 = vpop.f32.mrf.mxu3  ;;  %v3852_v58 = vld [vmem:[#allocation4 + $0x60] sm:$0xf] }
  0xb6   :  { %1620 = vmatpush.bf16.msra.mxu2 %v3653_v48  ;;  %v3733_v31 = vor.u32 %v4619_v23, %v3730_v55  ;;  %v3698_v48 = vld [vmem:[#allocation2 + $0x558] sm:$0xf0]  ;;  %v1281_v30 = vpop.f32.mrf.mxu0 }
  0xb7   :  { %1635 = vmatpush.bf16.msra.mxu0 %v3765_v7  ;;  %v3701_v62 = vor.u32 %v4611_v47, %v3698_v48  ;;  %v4539_v7 = vld [vmem:[#allocation2 + $0x30c] sm:$0xf]  ;;  %v3868_v47 = vld [vmem:[#allocation4 + $0x80] sm:$0xf]  ;;  %v4656_v48 = vld [vmem:[#allocation4 + $0x8c] sm:$0xf0] }
  0xb8   :  { %1594 = vmatpush.bf16.msrb.mxu1 %v3365_v3  ;;  %v4635_v3 = vld [vmem:[#allocation2 + $0x60c] sm:$0xf]  ;;  %v3413_v23 = vor.u32 %v4539_v7, %v3410_v12 }
  0xb9   :  { %1607 = vmatpush.bf16.msra.mxu3 %v3509_v0  ;;  %v3282_v0 = vld [vmem:[#allocation2 + $0x218] sm:$0xf0]  ;;  %v3797_v19 = vor.u32 %v4635_v3, %v3794_v4  ;;  %v3836_v4 = vld [vmem:[#allocation4 + $0x40] sm:$0xf] }
  0xba   :  { %1621 = vmatpush.bf16.msra.mxu2 %v3637_v1  ;;  %v4607_v1 = vld [vmem:[#allocation2 + $0x52c] sm:$0xf]  ;;  %v3285_v11 = vor.u32 %v4507_v63, %v3282_v0  ;;  %v1295_v8 = vpop.f32.mrf.mxu1  ;;  %v3980_v63 = vld [vmem:[#allocation4 + $0x160] sm:$0xf]  ;;  %v4684_v0 = vld [vmem:[#allocation4 + $0x16c] sm:$0xf0] }
  0xbb   :  { %1636 = vmatpush.bf16.msra.mxu0 %v3749_v20  ;;  %v3685_v15 = vor.u32 %v4607_v1, %v3682_v2  ;;  %v3666_v20 = vld [vmem:[#allocation2 + $0x518] sm:$0xf0]  ;;  %v1309_v41 = vpop.f32.mrf.mxu2  ;;  %v3853_v1 = vor.u32 %v4652_v59, %v3852_v58  ;;  %v4728_v58 = vld [vmem:[#allocation4 + $0x2cc] sm:$0xf0]  ;;  %v4654_v59 = vld [vmem:[#allocation4 + $0x84] sm:$0xf] }
  0xbc   :  { %1595 = vmatpush.bf16.msrb.mxu1 %v3349_v16  ;;  %v3916_v16 = vld [vmem:[#allocation4 + $0xe0] sm:$0xf]  ;;  %v3669_v26 = vor.u32 %v4603_v18, %v3666_v20  ;;  %v4644_v18 = vld [vmem:[#allocation4 + $0x2c] sm:$0xf0] }
  0xbd   :  { %1608 = vmatpush.bf16.msra.mxu3 %v3493_v13  ;;  %v4571_v13 = vld [vmem:[#allocation2 + $0x40c] sm:$0xf]  ;;  %v3948_v20 = vld [vmem:[#allocation4 + $0x120] sm:$0xf] }
  0xbe   :  { %1622 = vmatpush.bf16.msra.mxu2 %v3621_v14  ;;  %v3538_v14 = vld [vmem:[#allocation2 + $0x418] sm:$0xf0] }
  0xbf   :  { %1637 = vmatpush.bf16.msra.mxu0 %v3733_v31  ;;  %v3541_v55 = vor.u32 %v4571_v13, %v3538_v14  ;;  %v4028_v31 = vld [vmem:[#allocation4 + $0x1c0] sm:$0xf] }
  0xc0   :  { %1596 = vmatpush.bf16.msrb.mxu1 %v3333_v27  ;;  %v3900_v27 = vld [vmem:[#allocation4 + $0xc0] sm:$0xf]  ;;  %v4029_v40 = vor.u32 %v4696_v32, %v4028_v31  ;;  %v4698_v32 = vld [vmem:[#allocation4 + $0x1e4] sm:$0xf] }
  0xc1   :  { %1609 = vmatpush.bf16.msra.mxu3 %v3477_v24  ;;  %v3917_v24 = vor.u32 %v4668_v17, %v3916_v16  ;;  %v3901_v34 = vor.u32 %v4664_v28, %v3900_v27  ;;  %v3820_v17 = vld [vmem:[#allocation4 + $0x20] sm:$0xf]  ;;  %v4666_v27 = vld [vmem:[#allocation4 + $0xe4] sm:$0xf]  ;;  %v3918_v28 = vld [vmem:[#allocation4 + $0xf0] sm:$0xf0] }
  0xc2   :  { %1623 = vmatpush.bf16.msra.mxu2 %v3605_v25  ;;  %v278_v25 = vperm.slane %v4992_v9, 0 }
  0xc3   :  { %1638 = vmatpush.bf16.msra.mxu0 %v3717_v44  ;;  %v4692_v44 = vld [vmem:[#allocation4 + $0x1ac] sm:$0xf0] }
  0xc4   :  { %1597 = vmatpush.bf16.msrb.mxu1 %v3317_v39  ;;  %v4660_v39 = vld [vmem:[#allocation4 + $0xac] sm:$0xf0] }
  0xc5   :  { %1610 = vmatpush.bf16.msra.mxu3 %v3461_v35  ;;  %v1280_v35 = vadd.f32 %v1279_v53, %v278_v25  ;;  %v4688_v53 = vld [vmem:[#allocation4 + $0x18c] sm:$0xf0] }
  0xc6   :  { %1624 = vmatpush.bf16.msra.mxu2 %v3589_v36  ;;  %v1282_v36 = vadd.f32 %v1281_v30, %v278_v25  ;;  %v3804_v25 = vld [vmem:[#allocation4] sm:$0xf]  ;;  %v4672_v30 = vld [vmem:[#allocation4 + $0x10c] sm:$0xf0] }
  0xc7   :  { %1639 = vmatpush.bf16.msra.mxu0 %v3701_v62  ;;  %v1294_v45 = vadd.f32 %v4987_v61, %v1280_v35  ;;  %v1323_v62 = vpop.f32.mrf.mxu3  ;;  %v1363_v61 = vpop.f32.mrf.mxu2 }
  0xc8   :  { %1598 = vmatpush.bf16.msrb.mxu1 %v3301_v56  ;;  %v1296_v46 = vadd.f32 %v1295_v8, %v1282_v36  ;;  %v4046_v8 = vld [vmem:[#allocation4 + $0x1f0] sm:$0xf0]  ;;  %v3921_v36 = vor.u32 %v4666_v27, %v3918_v28  ;;  %v4108_v27 = vld [vmem:[#allocation4 + $0x260] sm:$0xf]  ;;  %v4642_v28 = vld [vmem:[#allocation4 + $0x24] sm:$0xf] }
  0xc9   :  { %1611 = vmatpush.bf16.msra.mxu3 %v3445_v49  ;;  %v4013_v49 = vor.u32 %v4692_v44, %v4012_v43  ;;  %v1308_v57 = vadd.f32 %v4994_v10, %v1294_v45  ;;  %v4680_v10 = vld [vmem:[#allocation4 + $0x14c] sm:$0xf0]  ;;  %v4694_v44 = vld [vmem:[#allocation4 + $0x1c4] sm:$0xf] }
  0xca   :  { %1625 = vmatpush.bf16.msra.mxu2 %v3573_v51 }
  0xcb   :  { %1640 = vmatpush.bf16.msra.mxu0 %v3685_v15  ;;  %v1335_v51 = vpop.f32.mrf.mxu0  ;;  %v1322_v2 = vadd.f32 %v1321_v33, %v1308_v57 }
  0xcc   :  { %1599 = vmatpush.bf16.msrb.mxu1 %v3285_v11  ;;  %v1349_v56 = vpop.f32.mrf.mxu1  ;;  %v3964_v11 = vld [vmem:[#allocation4 + $0x140] sm:$0xf] }
  0xcd   :  { %1612 = vmatpush.bf16.msra.mxu3 %v3429_v5  ;;  %v4648_v5 = vld [vmem:[#allocation4 + $0x4c] sm:$0xf0]  ;;  %v1336_v12 = vadd.f32 %v1335_v51, %v1322_v2  ;;  %v3886_v51 = vld [vmem:[#allocation4 + $0xb0] sm:$0xf0] }
  0xce   :  { %1626 = vmatpush.bf16.msra.mxu2 %v3557_v6  ;;  %v3981_v6 = vor.u32 %v4684_v0, %v3980_v63  ;;  %v3837_v15 = vor.u32 %v4648_v5, %v3836_v4  ;;  %v3998_v2 = vld [vmem:[#allocation4 + $0x190] sm:$0xf0]  ;;  %v4140_v4 = vld [vmem:[#allocation4 + $0x2a0] sm:$0xf]  ;;  %v4724_v5 = vld [vmem:[#allocation4 + $0x2ac] sm:$0xf0] }
  0xcf   :  { %1600 = vmatmul.bf16.vlgmr.msrb.gmra.mxu1 %v4923_v54  ;;  %1641 = vmatpush.bf16.msra.mxu0 %v3669_v26  ;;  %v3885_v54 = vor.u32 %v4660_v39, %v3884_v38  ;;  %v1350_v22 = vadd.f32 %v1349_v56, %v1336_v12  ;;  %v4640_v26 = vld [vmem:[#allocation4 + $0xc] sm:$0xf0]  ;;  %v4662_v39 = vld [vmem:[#allocation4 + $0xc4] sm:$0xf] }
  0xd0   :  { %1655 = vmatpush.bf16.msra.mxu1 %v3797_v19  ;;  %v3965_v19 = vor.u32 %v4680_v10, %v3964_v11  ;;  %v3805_v33 = vor.u32 %v4640_v26, %v3804_v25  ;;  %v4690_v56 = vld [vmem:[#allocation4 + $0x1a4] sm:$0xf]  ;;  %v4141_v10 = vor.u32 %v4724_v5, %v4140_v4 }
  0xd1   :  { %1613 = vmatpush.bf16.msra.mxu3 %v3413_v23  ;;  %v1365_v23 = vpop.f32.mrf.mxu2  ;;  %v1364_v31 = vadd.f32 %v1363_v61, %v1350_v22  ;;  %v4682_v12 = vld [vmem:[#allocation4 + $0x164] sm:$0xf] }
  0xd2   :  { %1627 = vmatpush.bf16.msra.mxu2 %v3541_v55  ;;  %1642 = vmatmul.bf16.vlgmr.msra.gmra.mxu0 %v4965_v42  ;;  %v3997_v42 = vor.u32 %v4688_v53, %v3996_v52  ;;  %v3821_v55 = vor.u32 %v4644_v18, %v3820_v17  ;;  %v3838_v17 = vld [vmem:[#allocation4 + $0x50] sm:$0xf0]  ;;  %v4678_v22 = vld [vmem:[#allocation4 + $0x144] sm:$0xf] }
  0xd3   :  { %v1337_v7 = vpop.f32.mrf.mxu0  ;;  %v5005_v35 = vpop.f32.mrf.mxu3  ;;  %v1662_v43 = vmax.f32 %v1364_v31, 0.0 }
  0xd4   :  { %2466 = vmatpush.bf16.msrb.mxu1 %v4045_v29  ;;  %1614 = vmatmul.bf16.vlgmr.msra.gmra.mxu3 %v4927_v60  ;;  %v3869_v60 = vor.u32 %v4656_v48, %v3868_v47  ;;  %v1351_v14 = vpop.f32.mrf.mxu1  ;;  %v3932_v29 = vld [vmem:[#allocation4 + $0x100] sm:$0xf]  ;;  %v4732_v48 = vld [vmem:[#allocation4 + $0x2ec] sm:$0xf0] }
  0xd5   :  { %2452 = vmatpush.bf16.msrb.mxu3 %v3917_v24  ;;  %1628 = vmatmul.bf16.vlgmr.msra.gmra.mxu2 %v4963_v37  ;;  %v1310_v37 = vadd.f32 %v1309_v41, %v1296_v46  ;;  %v3933_v38 = vor.u32 %v4672_v30, %v3932_v29  ;;  %v4049_v41 = vor.u32 %v4698_v32, %v4046_v8  ;;  %v4172_v47 = vld [vmem:[#allocation4 + $0x2e0] sm:$0xf]  ;;  %v3822_v29 = vld [vmem:[#allocation4 + $0x30] sm:$0xf0]  ;;  %v4674_v8 = vld [vmem:[#allocation4 + $0x124] sm:$0xf] }
  0xd6   :  { %v4173_v53 = vor.u32 %v4732_v48, %v4172_v47  ;;  %v4669_v48 = vld [vmem:[#allocation4 + $0xf4] sm:$0xf0] }
  0xd7   :  { %v1324_v3 = vadd.f32 %v1323_v62, %v1310_v37  ;;  %v4156_v37 = vld [vmem:[#allocation4 + $0x2c0] sm:$0xf] }
  0xd8   :  { %2467 = vmatpush.bf16.msrb.mxu1 %v4029_v40  ;;  %v3902_v40 = vld [vmem:[#allocation4 + $0xd0] sm:$0xf0]  ;;  %2480 = vmatpush.bf16.msrb.mxu2 %v4173_v53  ;;  %v4157_v61 = vor.u32 %v4728_v58, %v4156_v37  ;;  %v4708_v37 = vld [vmem:[#allocation4 + $0x22c] sm:$0xf0] }
  0xd9   :  { %2453 = vmatpush.bf16.msrb.mxu3 %v3901_v34  ;;  %v1338_v13 = vadd.f32 %v1337_v7, %v1324_v3  ;;  %v3905_v46 = vor.u32 %v4662_v39, %v3902_v40  ;;  %v1391_v63 = vpop.f32.mrf.mxu2  ;;  %v3854_v7 = vld [vmem:[#allocation4 + $0x70] sm:$0xf0]  ;;  %v4092_v39 = vld [vmem:[#allocation4 + $0x240] sm:$0xf]  ;;  %v4712_v40 = vld [vmem:[#allocation4 + $0x24c] sm:$0xf0] }
  0xdb   :  { %v1352_v16 = vadd.f32 %v1351_v14, %v1338_v13  ;;  %v1379_v0 = vpop.f32.mrf.mxu3  ;;  %v3982_v13 = vld [vmem:[#allocation4 + $0x170] sm:$0xf0] }
  0xdc   :  { %2468 = vmatpush.bf16.msrb.mxu1 %v4013_v49  ;;  %v4658_v49 = vld [vmem:[#allocation4 + $0xa4] sm:$0xf]  ;;  %2481 = vmatpush.bf16.msrb.mxu2 %v4157_v61  ;;  %v3985_v18 = vor.u32 %v4682_v12, %v3982_v13  ;;  %v3908_v61 = vld [vmem:[#allocation4 + $0xc8] sm:$0xf]  ;;  %v4661_v13 = vld [vmem:[#allocation4 + $0xb4] sm:$0xf0] }
  0xdd   :  { %2454 = vmatpush.bf16.msrb.mxu3 %v3885_v54  ;;  %v1366_v24 = vadd.f32 %v1365_v23, %v1352_v16  ;;  %v4030_v54 = vld [vmem:[#allocation4 + $0x1d0] sm:$0xf0]  ;;  %v3889_v57 = vor.u32 %v4658_v49, %v3886_v51  ;;  %v4646_v16 = vld [vmem:[#allocation4 + $0x44] sm:$0xf]  ;;  %v3892_v12 = vld [vmem:[#allocation4 + $0xa8] sm:$0xf] }
  0xde   :  { %v4033_v52 = vor.u32 %v4694_v44, %v4030_v54  ;;  %v3966_v23 = vld [vmem:[#allocation4 + $0x150] sm:$0xf0]  ;;  %v3841_v26 = vor.u32 %v4646_v16, %v3838_v17  ;;  %v3924_v44 = vld [vmem:[#allocation4 + $0xe8] sm:$0xf]  ;;  %v4670_v49 = vld [vmem:[#allocation4 + $0x104] sm:$0xf] }
  0xdf   :  { %3801 = vmatmul.msk.bf16.vlgmr.msra.gmra.mxu1 %vm1266_vm0, %v4947_v50  ;;  %v3949_v50 = vor.u32 %v4676_v21, %v3948_v20  ;;  %v1666_v34 = vmax.f32 %v1366_v24, 0.0  ;;  %v279_v24 = vperm.slane %v4992_v9, 1  ;;  %v3969_v30 = vor.u32 %v4678_v22, %v3966_v23  ;;  %v3934_v51 = vld [vmem:[#allocation4 + $0x110] sm:$0xf0] }
  0xe0   :  { %2469 = vmatpush.bf16.msrb.mxu1 %v3997_v42  ;;  %v3870_v42 = vld [vmem:[#allocation4 + $0x90] sm:$0xf0]  ;;  %2482 = vmatpush.bf16.msrb.mxu2 %v4141_v10 }
  0xe1   :  { %2455 = vmatpush.bf16.msrb.mxu3 %v3869_v60  ;;  %v5007_v45 = vpack.c.bf16 %v1666_v34, %v1662_v43  ;;  %v4014_v60 = vld [vmem:[#allocation4 + $0x1b0] sm:$0xf0]  ;;  %v3873_v3 = vor.u32 %v4654_v59, %v3870_v42  ;;  %v1393_v25 = vpop.f32.mrf.mxu2  ;;  %v1378_v34 = vadd.f32 %v5005_v35, %v279_v24  ;;  %v3925_v59 = vor.u32 %v4669_v48, %v3924_v44  ;;  %v3844_v44 = vld [vmem:[#allocation4 + $0x48] sm:$0xf]  ;;  %v4649_v48 = vld [vmem:[#allocation4 + $0x54] sm:$0xf0] }
  0xe2   :  { %v4017_v62 = vor.u32 %v4690_v56, %v4014_v60  ;;  %v3806_v43 = vld [vmem:[#allocation4 + $0x10] sm:$0xf0]  ;;  %v3937_v42 = vor.u32 %v4670_v49, %v3934_v51  ;;  %v4718_v49 = vld [vmem:[#allocation4 + $0x284] sm:$0xf] }
  0xe3   :  { %v4158_v22 = vld [vmem:[#allocation4 + $0x2d0] sm:$0xf0] }
  0xe4   :  { %2470 = vmatpush.bf16.msrb.mxu1 %v3981_v6  ;;  %v4650_v6 = vld [vmem:[#allocation4 + $0x64] sm:$0xf] }
  0xe5   :  { %2456 = vmatpush.bf16.msrb.mxu3 %v3853_v1  ;;  %v4686_v1 = vld [vmem:[#allocation4 + $0x184] sm:$0xf]  ;;  %v3857_v14 = vor.u32 %v4650_v6, %v3854_v7 }
  0xe6   :  { %v4001_v11 = vor.u32 %v4686_v1, %v3998_v2  ;;  %v4730_v7 = vld [vmem:[#allocation4 + $0x2e4] sm:$0xf] }
  0xe8   :  { %2471 = vmatpush.bf16.msrb.mxu1 %v3965_v19  ;;  %v4720_v19 = vld [vmem:[#allocation4 + $0x28c] sm:$0xf0] }
  0xe9   :  { %2457 = vmatpush.bf16.msrb.mxu3 %v3837_v15  ;;  %v4124_v15 = vld [vmem:[#allocation4 + $0x280] sm:$0xf] }
  0xeb   :  { %v1405_v20 = vpop.f32.mrf.mxu0 }
  0xec   :  { %2472 = vmatpush.bf16.msrb.mxu1 %v3949_v50  ;;  %v4716_v50 = vld [vmem:[#allocation4 + $0x26c] sm:$0xf0]  ;;  %v1419_v32 = vpop.f32.mrf.mxu1 }
  0xed   :  { %2458 = vmatpush.bf16.msrb.mxu3 %v3821_v55  ;;  %v4125_v55 = vor.u32 %v4720_v19, %v4124_v15  ;;  %v4109_v31 = vor.u32 %v4716_v50, %v4108_v27  ;;  %v3876_v19 = vld [vmem:[#allocation4 + $0x88] sm:$0xf] }
  0xef   :  { %2483 = vmatpush.bf16.msrb.mxu2 %v4125_v55  ;;  %v4657_v55 = vld [vmem:[#allocation4 + $0x94] sm:$0xf0] }
  0xf0   :  { %2473 = vmatpush.bf16.msrb.mxu1 %v3933_v38  ;;  %v3825_v38 = vor.u32 %v4642_v28, %v3822_v29  ;;  %v3877_v29 = vor.u32 %v4657_v55, %v3876_v19  ;;  %v4748_v19 = vld [vmem:[#allocation4 + $0x36c] sm:$0xf0]  ;;  %v3926_v55 = vld [vmem:[#allocation4 + $0xf8] sm:$0xf0] }
  0xf1   :  { %2459 = vmatpush.bf16.msrb.mxu3 %v3805_v33  ;;  %v3950_v33 = vld [vmem:[#allocation4 + $0x130] sm:$0xf0] }
  0xf2   :  { %v3953_v54 = vor.u32 %v4674_v8, %v3950_v33  ;;  %v4653_v33 = vld [vmem:[#allocation4 + $0x74] sm:$0xf0] }
  0xf3   :  { %v5010_v21 = vpop.f32.mrf.mxu3  ;;  %2484 = vmatpush.bf16.msrb.mxu2 %v4109_v31  ;;  %v1407_v56 = vpop.f32.mrf.mxu0  ;;  %v4722_v31 = vld [vmem:[#allocation4 + $0x2a4] sm:$0xf] }
  0xf4   :  { %2522 = vmatpush.bf16.msra.mxu1 %v4049_v41  ;;  %2460 = vmatmul.bf16.vlgmr.msrb.gmra.mxu3 %v5007_v45  ;;  %v4638_v41 = vld [vmem:[#allocation4 + $0x4] sm:$0xf]  ;;  %v1421_v2 = vpop.f32.mrf.mxu1 }
  0xf5   :  { %2508 = vmatpush.bf16.msra.mxu3 %v3921_v36  ;;  %v1380_v36 = vadd.f32 %v1379_v0, %v279_v24  ;;  %v3809_v60 = vor.u32 %v4638_v41, %v3806_v43  ;;  %v4665_v0 = vld [vmem:[#allocation4 + $0xd4] sm:$0xf0] }
  0xf6   :  { %v3909_v5 = vor.u32 %v4665_v0, %v3908_v61  ;;  %v4701_v41 = vld [vmem:[#allocation4 + $0x1f4] sm:$0xf0]  ;;  %v4110_v61 = vld [vmem:[#allocation4 + $0x270] sm:$0xf0] }
  0xf7   :  { %v1394_v53 = vadd.f32 %v1393_v25, %v1380_v36  ;;  %v4300_v25 = vld [vmem:[#allocation4 + $0x3e0] sm:$0xf] }
  0xf8   :  { %2523 = vmatpush.bf16.msra.mxu1 %v4033_v52  ;;  %v1392_v52 = vadd.f32 %v1391_v63, %v1378_v34  ;;  %v1447_v35 = vpop.f32.mrf.mxu2  ;;  %v4060_v63 = vld [vmem:[#allocation4 + $0x200] sm:$0xf] }
  0xf9   :  { %2509 = vmatpush.bf16.msra.mxu3 %v3905_v46  ;;  %v4093_v46 = vor.u32 %v4712_v40, %v4092_v39  ;;  %v1408_v1 = vadd.f32 %v1407_v56, %v1394_v53  ;;  %v4284_v36 = vld [vmem:[#allocation4 + $0x3c0] sm:$0xf]  ;;  %v4052_v40 = vld [vmem:[#allocation4 + $0x1e8] sm:$0xf]  ;;  %v4756_v56 = vld [vmem:[#allocation4 + $0x3ac] sm:$0xf0] }
  0xfa   :  { %v1406_v58 = vadd.f32 %v1405_v20, %v1392_v52  ;;  %v4726_v20 = vld [vmem:[#allocation4 + $0x2c4] sm:$0xf]  ;;  %v4053_v51 = vor.u32 %v4701_v41, %v4052_v40  ;;  %v4126_v52 = vld [vmem:[#allocation4 + $0x290] sm:$0xf0]  ;;  %v4268_v53 = vld [vmem:[#allocation4 + $0x3a0] sm:$0xf] }
  0xfb   :  { %v1435_v47 = vpop.f32.mrf.mxu3  ;;  %2485 = vmatpush.bf16.msrb.mxu2 %v4093_v46  ;;  %v1422_v16 = vadd.f32 %v1421_v2, %v1408_v1  ;;  %v4161_v24 = vor.u32 %v4726_v20, %v4158_v22  ;;  %v4645_v1 = vld [vmem:[#allocation4 + $0x34] sm:$0xf0] }
  0xfc   :  { %2524 = vmatpush.bf16.msra.mxu1 %v4017_v62  ;;  %v1420_v4 = vadd.f32 %v1419_v32, %v1406_v58  ;;  %v4142_v32 = vld [vmem:[#allocation4 + $0x2b0] sm:$0xf0]  ;;  %v4269_v58 = vor.u32 %v4756_v56, %v4268_v53  ;;  %v4689_v22 = vld [vmem:[#allocation4 + $0x194] sm:$0xf0]  ;;  %v280_v53 = vperm.slane %v4992_v9, 2 }
  0xfd   :  { %2510 = vmatpush.bf16.msra.mxu3 %v3889_v57  ;;  %v4076_v57 = vld [vmem:[#allocation4 + $0x220] sm:$0xf]  ;;  %v1436_v17 = vadd.f32 %v1435_v47, %v1422_v16  ;;  %v4145_v34 = vor.u32 %v4722_v31, %v4142_v32  ;;  %v4004_v16 = vld [vmem:[#allocation4 + $0x188] sm:$0xf]  ;;  %v4685_v31 = vld [vmem:[#allocation4 + $0x174] sm:$0xf0] }
  0xfe   :  { %v4077_v62 = vor.u32 %v4708_v37, %v4076_v57  ;;  %v1434_v15 = vadd.f32 %v5010_v21, %v1420_v4  ;;  %v4697_v57 = vld [vmem:[#allocation4 + $0x1d4] sm:$0xf0]  ;;  %v4129_v37 = vor.u32 %v4718_v49, %v4126_v52  ;;  %v4020_v4 = vld [vmem:[#allocation4 + $0x1a8] sm:$0xf]  ;;  %v4663_v32 = vld [vmem:[#allocation4 + $0xcc] sm:$0xf] }
  0xff   :  { %v3894_v49 = vld [vmem:[#allocation4 + $0xb8] sm:$0xf0] }
 0x100   :  { %2525 = vmatpush.bf16.msra.mxu1 %v4001_v11  ;;  %2486 = vmatpush.bf16.msrb.mxu2 %v4077_v62  ;;  %v4174_v11 = vld [vmem:[#allocation4 + $0x2f0] sm:$0xf0]  ;;  %v1449_v23 = vpop.f32.mrf.mxu2  ;;  %v1448_v27 = vadd.f32 %v1447_v35, %v1434_v15  ;;  %v4714_v62 = vld [vmem:[#allocation4 + $0x264] sm:$0xf] }
 0x101   :  { %2511 = vmatpush.bf16.msra.mxu3 %v3873_v3  ;;  %v4704_v3 = vld [vmem:[#allocation4 + $0x20c] sm:$0xf0]  ;;  %v1450_v28 = vadd.f32 %v1449_v23, %v1436_v17  ;;  %v4113_v2 = vor.u32 %v4714_v62, %v4110_v61  ;;  %v4667_v23 = vld [vmem:[#allocation4 + $0xec] sm:$0xf]  ;;  %v3878_v61 = vld [vmem:[#allocation4 + $0x98] sm:$0xf0] }
 0x102   :  { %v4061_v6 = vor.u32 %v4704_v3, %v4060_v63  ;;  %v4252_v63 = vld [vmem:[#allocation4 + $0x380] sm:$0xf]  ;;  %v4752_v3 = vld [vmem:[#allocation4 + $0x38c] sm:$0xf0] }
 0x103   :  { %v1461_v10 = vpop.f32.mrf.mxu3  ;;  %v4736_v62 = vld [vmem:[#allocation4 + $0x30c] sm:$0xf0] }
 0x104   :  { %2526 = vmatpush.bf16.msra.mxu1 %v3985_v18  ;;  %2487 = vmatpush.bf16.msrb.mxu2 %v4061_v6  ;;  %v3893_v18 = vor.u32 %v4661_v13, %v3892_v12  ;;  %v1462_v21 = vadd.f32 %v1461_v10, %v1448_v27  ;;  %v4253_v6 = vor.u32 %v4752_v3, %v4252_v63  ;;  %v4641_v12 = vld [vmem:[#allocation4 + $0x14] sm:$0xf0]  ;;  %v4710_v13 = vld [vmem:[#allocation4 + $0x244] sm:$0xf]  ;;  %v4078_v27 = vld [vmem:[#allocation4 + $0x230] sm:$0xf0] }
 0x105   :  { %2512 = vmatpush.bf16.msra.mxu3 %v3857_v14  ;;  %v4177_v14 = vor.u32 %v4730_v7, %v4174_v11  ;;  %v3812_v11 = vld [vmem:[#allocation4 + $0x8] sm:$0xf] }
 0x108   :  { %2527 = vmatpush.bf16.msra.mxu1 %v3969_v30  ;;  %2536 = vmatpush.bf16.msra.mxu2 %v4177_v14  ;;  %v3860_v30 = vld [vmem:[#allocation4 + $0x68] sm:$0xf]  ;;  %v4094_v14 = vld [vmem:[#allocation4 + $0x250] sm:$0xf0] }
 0x109   :  { %2513 = vmatpush.bf16.msra.mxu3 %v3841_v26  ;;  %v4764_v26 = vld [vmem:[#allocation4 + $0x3ec] sm:$0xf0]  ;;  %v3861_v47 = vor.u32 %v4653_v33, %v3860_v30  ;;  %v4097_v17 = vor.u32 %v4710_v13, %v4094_v14 }
 0x10a   :  { %v4301_v50 = vor.u32 %v4764_v26, %v4300_v25  ;;  %v3813_v25 = vor.u32 %v4641_v12, %v3812_v11  ;;  %v4706_v26 = vld [vmem:[#allocation4 + $0x224] sm:$0xf]  ;;  %v4744_v30 = vld [vmem:[#allocation4 + $0x34c] sm:$0xf0]  ;;  %v3940_v11 = vld [vmem:[#allocation4 + $0x108] sm:$0xf] }
 0x10b   :  { %v1463_v8 = vpop.f32.mrf.mxu3  ;;  %v5019_v7 = vpop.f32.mrf.mxu0  ;;  %v4081_v33 = vor.u32 %v4706_v26, %v4078_v27  ;;  %v4651_v12 = vld [vmem:[#allocation4 + $0x6c] sm:$0xf] }
 0x10c   :  { %2528 = vmatpush.bf16.msra.mxu1 %v3953_v54  ;;  %2537 = vmatpush.bf16.msra.mxu2 %v4161_v24  ;;  %v1464_v39 = vadd.f32 %v1463_v8, %v1450_v28  ;;  %v1663_v54 = vmax.f32 %v1462_v21, 0.0  ;;  %v1475_v20 = vpop.f32.mrf.mxu1  ;;  %v3929_v28 = vor.u32 %v4667_v23, %v3926_v55  ;;  %v3988_v21 = vld [vmem:[#allocation4 + $0x168] sm:$0xf]  ;;  %v3910_v8 = vld [vmem:[#allocation4 + $0xd8] sm:$0xf0] }
 0x10d   :  { %2514 = vmatpush.bf16.msra.mxu3 %v3825_v38  ;;  %2494 = vmatpush.bf16.msrb.mxu0 %v4301_v50  ;;  %v4760_v38 = vld [vmem:[#allocation4 + $0x3cc] sm:$0xf0]  ;;  %v4005_v50 = vor.u32 %v4689_v22, %v4004_v16  ;;  %v3989_v41 = vor.u32 %v4685_v31, %v3988_v21  ;;  %v1476_v63 = vadd.f32 %v1475_v20, %v280_v53  ;;  %v4758_v16 = vld [vmem:[#allocation4 + $0x3c4] sm:$0xf]  ;;  %v4699_v22 = vld [vmem:[#allocation4 + $0x1ec] sm:$0xf] }
 0x10e   :  { %v4285_v43 = vor.u32 %v4760_v38, %v4284_v36  ;;  %v1667_v46 = vmax.f32 %v1464_v39, 0.0  ;;  %v4702_v38 = vld [vmem:[#allocation4 + $0x204] sm:$0xf]  ;;  %v4062_v39 = vld [vmem:[#allocation4 + $0x210] sm:$0xf0] }
 0x10f   :  { %v4054_v20 = vld [vmem:[#allocation4 + $0x1f8] sm:$0xf0]  ;;  %v4647_v26 = vld [vmem:[#allocation4 + $0x4c] sm:$0xf]  ;;  %v4270_v21 = vld [vmem:[#allocation4 + $0x3b0] sm:$0xf0] }
 0x110   :  { %2529 = vmatpush.bf16.msra.mxu1 %v3937_v42  ;;  %2538 = vmatpush.bf16.msra.mxu2 %v4145_v34  ;;  %v5016_v35 = vpack.c.bf16 %v1667_v46, %v1663_v54  ;;  %v3828_v42 = vld [vmem:[#allocation4 + $0x28] sm:$0xf]  ;;  %v4204_v54 = vld [vmem:[#allocation4 + $0x320] sm:$0xf]  ;;  %v4740_v46 = vld [vmem:[#allocation4 + $0x32c] sm:$0xf0]  ;;  %v4057_v27 = vor.u32 %v4699_v22, %v4054_v20 }
 0x111   :  { %2515 = vmatpush.bf16.msra.mxu3 %v3809_v60  ;;  %2495 = vmatpush.bf16.msrb.mxu0 %v4285_v43  ;;  %v4036_v60 = vld [vmem:[#allocation4 + $0x1c8] sm:$0xf]  ;;  %v3829_v10 = vor.u32 %v4645_v1, %v3828_v42  ;;  %v3913_v43 = vor.u32 %v4663_v32, %v3910_v8  ;;  %v4205_v52 = vor.u32 %v4740_v46, %v4204_v54  ;;  %v4188_v42 = vld [vmem:[#allocation4 + $0x300] sm:$0xf]  ;;  %v4762_v1 = vld [vmem:[#allocation4 + $0x3e4] sm:$0xf] }
 0x112   :  { %2474 = vmatmul.bf16.vlgmr.msrb.gmra.mxu1 %v5016_v35  ;;  %v4037_v0 = vor.u32 %v4697_v57, %v4036_v60  ;;  %v3956_v60 = vld [vmem:[#allocation4 + $0x128] sm:$0xf]  ;;  %v4677_v57 = vld [vmem:[#allocation4 + $0x134] sm:$0xf0]  ;;  %v4695_v31 = vld [vmem:[#allocation4 + $0x1cc] sm:$0xf] }
 0x113   :  { %v5021_v40 = vpop.f32.mrf.mxu0  ;;  %v4038_v32 = vld [vmem:[#allocation4 + $0x1d8] sm:$0xf0]  ;;  %v4738_v22 = vld [vmem:[#allocation4 + $0x324] sm:$0xf]  ;;  %v4206_v20 = vld [vmem:[#allocation4 + $0x330] sm:$0xf0] }
 0x114   :  { %2516 = vmatmul.bf16.vlgmr.msra.gmra.mxu3 %v5007_v45  ;;  %2578 = vmatpush.bf16.msrb.mxu1 %v4053_v51  ;;  %v4065_v51 = vor.u32 %v4702_v38, %v4062_v39  ;;  %v1477_v56 = vpop.f32.mrf.mxu1  ;;  %v4041_v38 = vor.u32 %v4695_v31, %v4038_v32  ;;  %v3830_v39 = vld [vmem:[#allocation4 + $0x38] sm:$0xf0]  ;;  %v281_v31 = vperm.slane %v4992_v9, 3  ;;  %v4675_v32 = vld [vmem:[#allocation4 + $0x12c] sm:$0xf] }
 0x115   :  { %2564 = vmatpush.bf16.msrb.mxu3 %v3925_v59  ;;  %v3845_v59 = vor.u32 %v4649_v48, %v3844_v44  ;;  %2539 = vmatpush.bf16.msra.mxu2 %v4129_v37  ;;  %v3972_v44 = vld [vmem:[#allocation4 + $0x148] sm:$0xf]  ;;  %v4659_v48 = vld [vmem:[#allocation4 + $0xac] sm:$0xf] }
 0x116   :  { %2496 = vmatpush.bf16.msrb.mxu0 %v4269_v58  ;;  %v3897_v58 = vor.u32 %v4659_v48, %v3894_v49 }
 0x117   :  { %v1489_v36 = vpop.f32.mrf.mxu3 }
 0x118   :  { %2579 = vmatpush.bf16.msrb.mxu1 %v4037_v0  ;;  %v4189_v0 = vor.u32 %v4736_v62, %v4188_v42  ;;  %v1517_v13 = vpop.f32.mrf.mxu2  ;;  %v4687_v42 = vld [vmem:[#allocation4 + $0x18c] sm:$0xf]  ;;  %v4006_v62 = vld [vmem:[#allocation4 + $0x198] sm:$0xf0] }
 0x119   :  { %2565 = vmatpush.bf16.msrb.mxu3 %v3909_v5  ;;  %v4693_v5 = vld [vmem:[#allocation4 + $0x1b4] sm:$0xf0]  ;;  %2540 = vmatpush.bf16.msra.mxu2 %v4113_v2  ;;  %v4302_v2 = vld [vmem:[#allocation4 + $0x3f0] sm:$0xf0] }
 0x11a   :  { %v4021_v15 = vor.u32 %v4693_v5, %v4020_v4  ;;  %2497 = vmatpush.bf16.msrb.mxu0 %v4253_v6  ;;  %v4305_v3 = vor.u32 %v4762_v1, %v4302_v2  ;;  %v3957_v5 = vor.u32 %v4677_v57, %v3956_v60  ;;  %v3814_v57 = vld [vmem:[#allocation4 + $0x18] sm:$0xf0] }
 0x11b   :  { %v5026_v4 = vpop.f32.mrf.mxu0 }
 0x11c   :  { %2580 = vmatpush.bf16.msrb.mxu1 %v4021_v15  ;;  %v3862_v15 = vld [vmem:[#allocation4 + $0x78] sm:$0xf0] }
 0x11d   :  { %2566 = vmatpush.bf16.msrb.mxu3 %v3893_v18  ;;  %v4236_v18 = vld [vmem:[#allocation4 + $0x360] sm:$0xf]  ;;  %2541 = vmatpush.bf16.msra.mxu2 %v4097_v17  ;;  %v4286_v17 = vld [vmem:[#allocation4 + $0x3d0] sm:$0xf0] }
 0x11e   :  { %v4237_v24 = vor.u32 %v4748_v19, %v4236_v18  ;;  %v1490_v18 = vadd.f32 %v1489_v36, %v1476_v63  ;;  %v1478_v19 = vadd.f32 %v1477_v56, %v280_v53  ;;  %v4289_v23 = vor.u32 %v4758_v16, %v4286_v17  ;;  %v4639_v53 = vld [vmem:[#allocation4 + $0xc] sm:$0xf]  ;;  %v4180_v16 = vld [vmem:[#allocation4 + $0x2e8] sm:$0xf]  ;;  %v4733_v17 = vld [vmem:[#allocation4 + $0x2f4] sm:$0xf0] }
 0x11f   :  { %v1491_v14 = vpop.f32.mrf.mxu3  ;;  %v3817_v1 = vor.u32 %v4639_v53, %v3814_v57  ;;  %v4009_v63 = vor.u32 %v4687_v42, %v4006_v62  ;;  %v4717_v53 = vld [vmem:[#allocation4 + $0x274] sm:$0xf0]  ;;  %v4100_v62 = vld [vmem:[#allocation4 + $0x248] sm:$0xf] }
 0x120   :  { %2498 = vmatpush.bf16.msrb.mxu0 %v4237_v24  ;;  %2581 = vmatpush.bf16.msrb.mxu1 %v4005_v50  ;;  %v3846_v50 = vld [vmem:[#allocation4 + $0x58] sm:$0xf0]  ;;  %v1519_v49 = vpop.f32.mrf.mxu2 }
 0x121   :  { %2567 = vmatpush.bf16.msrb.mxu3 %v3877_v29  ;;  %v4220_v29 = vld [vmem:[#allocation4 + $0x340] sm:$0xf]  ;;  %2542 = vmatpush.bf16.msra.mxu2 %v4081_v33  ;;  %v3849_v33 = vor.u32 %v4647_v26, %v3846_v50  ;;  %v4181_v26 = vor.u32 %v4733_v17, %v4180_v16  ;;  %v4164_v50 = vld [vmem:[#allocation4 + $0x2c8] sm:$0xf]  ;;  %v4731_v17 = vld [vmem:[#allocation4 + $0x2ec] sm:$0xf] }
 0x122   :  { %v4221_v34 = vor.u32 %v4744_v30, %v4220_v29  ;;  %2530 = vmatmul.bf16.vlgmr.msra.gmra.mxu1 %v5016_v35  ;;  %v1504_v29 = vadd.f32 %v5019_v7, %v1490_v18  ;;  %v1492_v30 = vadd.f32 %v1491_v14, %v1478_v19  ;;  %v4691_v7 = vld [vmem:[#allocation4 + $0x1ac] sm:$0xf] }
 0x123   :  { %v1561_v46 = vpop.f32.mrf.mxu0 }
 0x124   :  { %2499 = vmatpush.bf16.msrb.mxu0 %v4221_v34  ;;  %2582 = vmatpush.bf16.msrb.mxu1 %v3989_v41  ;;  %v4643_v34 = vld [vmem:[#allocation4 + $0x2c] sm:$0xf]  ;;  %v4750_v41 = vld [vmem:[#allocation4 + $0x384] sm:$0xf]  ;;  %v1506_v54 = vadd.f32 %v5021_v40, %v1492_v30  ;;  %v4190_v30 = vld [vmem:[#allocation4 + $0x310] sm:$0xf0] }
 0x125   :  { %2568 = vmatpush.bf16.msrb.mxu3 %v3861_v47  ;;  %v4681_v47 = vld [vmem:[#allocation4 + $0x154] sm:$0xf0]  ;;  %2543 = vmatpush.bf16.msra.mxu2 %v4065_v51 }
 0x126   :  { %v3973_v37 = vor.u32 %v4681_v47, %v3972_v44  ;;  %v1518_v44 = vadd.f32 %v1517_v13, %v1504_v29  ;;  %v4022_v47 = vld [vmem:[#allocation4 + $0x1b8] sm:$0xf0]  ;;  %v4734_v29 = vld [vmem:[#allocation4 + $0x304] sm:$0xf] }
 0x127   :  { %v4025_v60 = vor.u32 %v4691_v7, %v4022_v47  ;;  %v4132_v7 = vld [vmem:[#allocation4 + $0x288] sm:$0xf]  ;;  %v4721_v47 = vld [vmem:[#allocation4 + $0x294] sm:$0xf0] }
 0x128   :  { %2500 = vmatpush.bf16.msrb.mxu0 %v4205_v52  ;;  %2583 = vmatpush.bf16.msrb.mxu1 %v3973_v37  ;;  %v3833_v52 = vor.u32 %v4643_v34, %v3830_v39  ;;  %v4746_v37 = vld [vmem:[#allocation4 + $0x364] sm:$0xf] }
 0x129   :  { %2569 = vmatpush.bf16.msrb.mxu3 %v3845_v59  ;;  %v4655_v59 = vld [vmem:[#allocation4 + $0x8c] sm:$0xf] }
 0x12a   :  { %v3881_v6 = vor.u32 %v4655_v59, %v3878_v61  ;;  %v1520_v59 = vadd.f32 %v1519_v49, %v1506_v54  ;;  %v3942_v54 = vld [vmem:[#allocation4 + $0x118] sm:$0xf0] }
 0x12c   :  { %2501 = vmatpush.bf16.msrb.mxu0 %v4189_v0  ;;  %v1531_v55 = vpop.f32.mrf.mxu1  ;;  %2584 = vmatpush.bf16.msrb.mxu1 %v3957_v5  ;;  %v4222_v5 = vld [vmem:[#allocation4 + $0x350] sm:$0xf0] }
 0x12d   :  { %2570 = vmatpush.bf16.msrb.mxu3 %v3829_v10  ;;  %v4673_v10 = vld [vmem:[#allocation4 + $0x114] sm:$0xf0]  ;;  %v1532_v51 = vadd.f32 %v1531_v55, %v1518_v44  ;;  %v4671_v44 = vld [vmem:[#allocation4 + $0x10c] sm:$0xf] }
 0x12e   :  { %v3941_v24 = vor.u32 %v4673_v10, %v3940_v11  ;;  %v4683_v10 = vld [vmem:[#allocation4 + $0x16c] sm:$0xf] }
 0x130   :  { %2550 = vmatpush.bf16.msra.mxu0 %v4305_v3  ;;  %2585 = vmatpush.bf16.msrb.mxu1 %v3941_v24  ;;  %v4742_v3 = vld [vmem:[#allocation4 + $0x344] sm:$0xf]  ;;  %v4679_v24 = vld [vmem:[#allocation4 + $0x14c] sm:$0xf] }
 0x131   :  { %2571 = vmatpush.bf16.msrb.mxu3 %v3813_v25  ;;  %v3865_v25 = vor.u32 %v4651_v12, %v3862_v15  ;;  %v3990_v12 = vld [vmem:[#allocation4 + $0x178] sm:$0xf0]  ;;  %v4225_v13 = vor.u32 %v4742_v3, %v4222_v5  ;;  %v1587_v15 = vpop.f32.mrf.mxu0  ;;  %v4709_v3 = vld [vmem:[#allocation4 + $0x234] sm:$0xf0] }
 0x132   :  { %v3993_v19 = vor.u32 %v4683_v10, %v3990_v12 }
 0x133   :  { %2586 = vmatmul.bf16.vlgmr.msrb.gmra.mxu1 %v5016_v35 }
 0x134   :  { %2572 = vmatmul.bf16.vlgmr.msrb.gmra.mxu3 %v5007_v45  ;;  %2551 = vmatpush.bf16.msra.mxu0 %v4289_v23  ;;  %v1533_v56 = vpop.f32.mrf.mxu1 }
 0x135   :  { %2620 = vmatpush.bf16.msra.mxu3 %v3929_v28  ;;  %v4754_v28 = vld [vmem:[#allocation4 + $0x3a4] sm:$0xf]  ;;  %2634 = vmatpush.bf16.msra.mxu1 %v4057_v27  ;;  %v1534_v0 = vadd.f32 %v1533_v56, %v1520_v59 }
 0x136   :  { %v4273_v8 = vor.u32 %v4754_v28, %v4270_v21  ;;  %v4729_v28 = vld [vmem:[#allocation4 + $0x2d4] sm:$0xf0] }
 0x137   :  { %v1545_v36 = vpop.f32.mrf.mxu3  ;;  %v4165_v34 = vor.u32 %v4729_v28, %v4164_v50  ;;  %v4308_v50 = vld [vmem:[#allocation4 + $0x3e8] sm:$0xf]  ;;  %v4765_v28 = vld [vmem:[#allocation4 + $0x3f4] sm:$0xf0] }
 0x138   :  { %2552 = vmatpush.bf16.msra.mxu0 %v4273_v8  ;;  %v1546_v40 = vadd.f32 %v1545_v36, %v1532_v51  ;;  %v1573_v18 = vpop.f32.mrf.mxu2  ;;  %v3958_v8 = vld [vmem:[#allocation4 + $0x138] sm:$0xf0]  ;;  %v4725_v36 = vld [vmem:[#allocation4 + $0x2b4] sm:$0xf0]  ;;  %v4133_v51 = vor.u32 %v4721_v47, %v4132_v7  ;;  %v4260_v47 = vld [vmem:[#allocation4 + $0x388] sm:$0xf] }
 0x139   :  { %2621 = vmatpush.bf16.msra.mxu3 %v3913_v43  ;;  %v4254_v43 = vld [vmem:[#allocation4 + $0x390] sm:$0xf0]  ;;  %2635 = vmatpush.bf16.msra.mxu1 %v4041_v38  ;;  %v3961_v39 = vor.u32 %v4675_v32, %v3958_v8  ;;  %v4723_v32 = vld [vmem:[#allocation4 + $0x2ac] sm:$0xf]  ;;  %v4150_v8 = vld [vmem:[#allocation4 + $0x2b8] sm:$0xf0] }
 0x13a   :  { %v4257_v48 = vor.u32 %v4750_v41, %v4254_v43  ;;  %v1574_v41 = vadd.f32 %v1573_v18, %v281_v31  ;;  %v1589_v43 = vpop.f32.mrf.mxu0  ;;  %v4182_v18 = vld [vmem:[#allocation4 + $0x2f8] sm:$0xf0] }
 0x13b   :  { %v4118_v7 = vld [vmem:[#allocation4 + $0x278] sm:$0xf0] }
 0x13c   :  { %2553 = vmatpush.bf16.msra.mxu0 %v4257_v48  ;;  %v3945_v48 = vor.u32 %v4671_v44, %v3942_v54  ;;  %v1588_v49 = vadd.f32 %v1587_v15, %v1574_v41  ;;  %v4068_v15 = vld [vmem:[#allocation4 + $0x208] sm:$0xf]  ;;  %v4134_v41 = vld [vmem:[#allocation4 + $0x298] sm:$0xf0]  ;;  %v4757_v44 = vld [vmem:[#allocation4 + $0x3b4] sm:$0xf0] }
 0x13d   :  { %2622 = vmatpush.bf16.msra.mxu3 %v3897_v58  ;;  %v4238_v58 = vld [vmem:[#allocation4 + $0x370] sm:$0xf0]  ;;  %2636 = vmatpush.bf16.msra.mxu1 %v4025_v60 }
 0x13e   :  { %v4241_v61 = vor.u32 %v4746_v37, %v4238_v58 }
 0x13f   :  { %v1547_v2 = vpop.f32.mrf.mxu3 }
 0x140   :  { %v1548_v11 = vadd.f32 %v1547_v2, %v1534_v0  ;;  %2554 = vmatpush.bf16.msra.mxu0 %v4241_v61  ;;  %v4713_v61 = vld [vmem:[#allocation4 + $0x254] sm:$0xf0] }
 0x141   :  { %2623 = vmatpush.bf16.msra.mxu3 %v3881_v6  ;;  %v1560_v6 = vadd.f32 %v5026_v4, %v1546_v40  ;;  %2637 = vmatpush.bf16.msra.mxu1 %v4009_v63  ;;  %v4209_v4 = vor.u32 %v4738_v22, %v4206_v20  ;;  %v4084_v63 = vld [vmem:[#allocation4 + $0x228] sm:$0xf] }
 0x142   :  { %v1562_v14 = vadd.f32 %v1561_v46, %v1548_v11  ;;  %v1575_v46 = vpop.f32.mrf.mxu2  ;;  %v4085_v12 = vor.u32 %v4709_v3, %v4084_v63  ;;  %v4741_v63 = vld [vmem:[#allocation4 + $0x334] sm:$0xf0] }
 0x143   :  { %v1664_v23 = vmax.f32 %v1560_v6, 0.0  ;;  %v1576_v37 = vadd.f32 %v1575_v46, %v281_v31  ;;  %v4309_v31 = vor.u32 %v4765_v28, %v4308_v50  ;;  %v4739_v50 = vld [vmem:[#allocation4 + $0x32c] sm:$0xf]  ;;  %v4214_v28 = vld [vmem:[#allocation4 + $0x338] sm:$0xf0] }
 0x144   :  { %v1668_v55 = vmax.f32 %v1562_v14, 0.0  ;;  %2555 = vmatpush.bf16.msra.mxu0 %v4225_v13 }
 0x145   :  { %2624 = vmatpush.bf16.msra.mxu3 %v3865_v25  ;;  %v3974_v25 = vld [vmem:[#allocation4 + $0x158] sm:$0xf0]  ;;  %2638 = vmatpush.bf16.msra.mxu1 %v3993_v19  ;;  %v1590_v0 = vadd.f32 %v1589_v43, %v1576_v37  ;;  %v4276_v43 = vld [vmem:[#allocation4 + $0x3a8] sm:$0xf] }
 0x146   :  { %v5033_v27 = vpack.c.bf16 %v1668_v55, %v1664_v23  ;;  %v3977_v21 = vor.u32 %v4679_v24, %v3974_v25  ;;  %v4185_v55 = vor.u32 %v4731_v17, %v4182_v18  ;;  %v4727_v25 = vld [vmem:[#allocation4 + $0x2cc] sm:$0xf]  ;;  %v4277_v46 = vor.u32 %v4757_v44, %v4276_v43  ;;  %v4278_v18 = vld [vmem:[#allocation4 + $0x3b8] sm:$0xf0]  ;;  %v4766_v44 = vld [vmem:[%s5166_s5] sm:$0xff] }
 0x147   :  { %v4755_v17 = vld [vmem:[#allocation4 + $0x3ac] sm:$0xf] }
 0x148   :  { %2488 = vmatmul.bf16.vlgmr.msrb.gmra.mxu2 %v5033_v27  ;;  %2556 = vmatpush.bf16.msra.mxu0 %v4209_v4  ;;  %v4166_v4 = vld [vmem:[#allocation4 + $0x2d8] sm:$0xf0]  ;;  %v4779_v43 = vld [vmem:[%s5166_s5 + $0x68] sm:$0xff] }
 0x149   :  { %2625 = vmatpush.bf16.msra.mxu3 %v3849_v33  ;;  %v4193_v33 = vor.u32 %v4734_v29, %v4190_v30  ;;  %2592 = vmatpush.bf16.msrb.mxu2 %v4181_v26  ;;  %v4169_v30 = vor.u32 %v4727_v25, %v4166_v4  ;;  %v4230_v4 = vld [vmem:[#allocation4 + $0x358] sm:$0xf0] }
 0x14a   :  { %2639 = vmatpush.bf16.msra.mxu1 %v3977_v21 }
 0x14c   :  { %v1601_v38 = vpop.f32.mrf.mxu1  ;;  %2557 = vmatpush.bf16.msra.mxu0 %v4193_v33 }
 0x14d   :  { %2626 = vmatpush.bf16.msra.mxu3 %v3833_v52  ;;  %2593 = vmatpush.bf16.msrb.mxu2 %v4165_v34  ;;  %v4116_v52 = vld [vmem:[#allocation4 + $0x268] sm:$0xf]  ;;  %v1602_v60 = vadd.f32 %v1601_v38, %v1588_v49 }
 0x14e   :  { %2640 = vmatpush.bf16.msra.mxu1 %v3961_v39  ;;  %v4117_v59 = vor.u32 %v4717_v53, %v4116_v52  ;;  %v4292_v34 = vld [vmem:[#allocation4 + $0x3c8] sm:$0xf]  ;;  %v4719_v39 = vld [vmem:[#allocation4 + $0x28c] sm:$0xf]  ;;  %v4102_v53 = vld [vmem:[#allocation4 + $0x258] sm:$0xf0] }
 0x14f   :  { %v1643_v40 = vpop.f32.mrf.mxu0  ;;  %v4137_v54 = vor.u32 %v4719_v39, %v4134_v41  ;;  %v4711_v52 = vld [vmem:[#allocation4 + $0x24c] sm:$0xf]  ;;  %v4780_v39 = vld [vmem:[%s5166_s5 + $0x70] sm:$0xff] }
 0x150   :  { %v4767_v41 = vld [vmem:[%s5166_s5 + $0x8] sm:$0xff] }
 0x151   :  { %2627 = vmatpush.bf16.msra.mxu3 %v3817_v1  ;;  %v4101_v1 = vor.u32 %v4713_v61, %v4100_v62 }
 0x152   :  { %2641 = vmatpush.bf16.msra.mxu1 %v3945_v48  ;;  %v4753_v48 = vld [vmem:[#allocation4 + $0x394] sm:$0xf0] }
 0x154   :  { %2628 = vmatmul.bf16.vlgmr.msra.gmra.mxu3 %v5007_v45  ;;  %v4148_v45 = vld [vmem:[#allocation4 + $0x2a8] sm:$0xf]  ;;  %v1603_v56 = vpop.f32.mrf.mxu1 }
 0x155   :  { %v4149_v9 = vor.u32 %v4725_v36, %v4148_v45  ;;  %2642 = vmatmul.bf16.vlgmr.msra.gmra.mxu1 %v5016_v35  ;;  %v1604_v5 = vadd.f32 %v1603_v56, %v1590_v0  ;;  %v4705_v35 = vld [vmem:[#allocation4 + $0x214] sm:$0xf0]  ;;  %v4153_v36 = vor.u32 %v4723_v32, %v4150_v8  ;;  %v4244_v56 = vld [vmem:[#allocation4 + $0x368] sm:$0xf]  ;;  %v4703_v0 = vld [vmem:[#allocation4 + $0x20c] sm:$0xf] }
 0x156   :  { %v4069_v20 = vor.u32 %v4705_v35, %v4068_v15  ;;  %v4761_v45 = vld [vmem:[#allocation4 + $0x3d4] sm:$0xf0]  ;;  %v4759_v15 = vld [vmem:[#allocation4 + $0x3cc] sm:$0xf]  ;;  %v4294_v35 = vld [vmem:[#allocation4 + $0x3d8] sm:$0xf0] }
 0x157   :  { %2594 = vmatpush.bf16.msrb.mxu2 %v4149_v9  ;;  %v1615_v57 = vpop.f32.mrf.mxu3  ;;  %v1645_v19 = vpop.f32.mrf.mxu0  ;;  %v4293_v38 = vor.u32 %v4761_v45, %v4292_v34  ;;  %v4715_v9 = vld [vmem:[#allocation4 + $0x26c] sm:$0xf]  ;;  %v4773_v32 = vld [vmem:[%s5166_s5 + $0x38] sm:$0xff]  ;;  %v4772_v8 = vld [vmem:[%s5166_s5 + $0x30] sm:$0xff] }
 0x158   :  { %v1629_v58 = vpop.f32.mrf.mxu2  ;;  %v1616_v42 = vadd.f32 %v1615_v57, %v1602_v60  ;;  %2544 = vmatmul.bf16.vlgmr.msra.gmra.mxu2 %v5033_v27  ;;  %v4121_v49 = vor.u32 %v4715_v9, %v4118_v7  ;;  %v4749_v60 = vld [vmem:[#allocation4 + $0x374] sm:$0xf0]  ;;  %v4105_v57 = vor.u32 %v4711_v52, %v4102_v53  ;;  %2948 = vmatpush.bf16.msrb.mxu3 %v4773_v32  ;;  %v4771_v34 = vld [vmem:[%s5166_s5 + $0x28] sm:$0xff]  ;;  %v4770_v45 = vld [vmem:[%s5166_s5 + $0x20] sm:$0xff] }
 0x159   :  { %v4245_v37 = vor.u32 %v4749_v60, %v4244_v56  ;;  %v4789_v9 = vld [vmem:[%s5166_s5 + $0xb8] sm:$0xff]  ;;  %v4775_v52 = vld [vmem:[%s5166_s5 + $0x48] sm:$0xff]  ;;  %v5104_v56 = vld [vmem:[%s5165_s4] sm:$0xf] }
 0x15a   :  { %v1630_v2 = vadd.f32 %v1629_v58, %v1616_v42  ;;  %v4707_v58 = vld [vmem:[#allocation4 + $0x22c] sm:$0xf]  ;;  %v4745_v42 = vld [vmem:[#allocation4 + $0x354] sm:$0xf0] }
 0x15b   :  { %2595 = vmatpush.bf16.msrb.mxu2 %v4133_v51  ;;  %v4261_v51 = vor.u32 %v4753_v48, %v4260_v47  ;;  %v4787_v53 = vld [vmem:[%s5166_s5 + $0xa8] sm:$0xff] }
 0x15c   :  { %v1657_v6 = vpop.f32.mrf.mxu1  ;;  %v1644_v13 = vadd.f32 %v1643_v40, %v1630_v2  ;;  %v4228_v40 = vld [vmem:[#allocation4 + $0x348] sm:$0xf]  ;;  %2949 = vmatpush.bf16.msrb.mxu3 %v4772_v8 }
 0x15d   :  { %v4229_v61 = vor.u32 %v4745_v42, %v4228_v40  ;;  %v4212_v2 = vld [vmem:[#allocation4 + $0x328] sm:$0xf]  ;;  %v1804_v40 = vperm.slane %v5104_v56, 0  ;;  %v4785_v42 = vld [vmem:[%s5166_s5 + $0x98] sm:$0xff] }
 0x15e   :  { %v1658_v23 = vadd.f32 %v1657_v6, %v1644_v13  ;;  %v4196_v6 = vld [vmem:[#allocation4 + $0x308] sm:$0xf] }
 0x15f   :  { %2596 = vmatpush.bf16.msrb.mxu2 %v4117_v59  ;;  %v1617_v11 = vpop.f32.mrf.mxu3  ;;  %v4086_v59 = vld [vmem:[#allocation4 + $0x238] sm:$0xf0] }
 0x160   :  { %v1618_v10 = vadd.f32 %v1617_v11, %v1604_v5  ;;  %v1631_v14 = vpop.f32.mrf.mxu2  ;;  %v1665_v21 = vmax.f32 %v1658_v23, 0.0  ;;  %v4089_v62 = vor.u32 %v4707_v58, %v4086_v59  ;;  %v4213_v5 = vor.u32 %v4741_v63, %v4212_v2  ;;  %v4737_v11 = vld [vmem:[#allocation4 + $0x314] sm:$0xf0]  ;;  %2950 = vmatpush.bf16.msrb.mxu3 %v4771_v34  ;;  %v4784_v2 = vld [vmem:[%s5166_s5 + $0x90] sm:$0xff] }
 0x161   :  { %v4197_v13 = vor.u32 %v4737_v11, %v4196_v6 }
 0x162   :  { %v1632_v16 = vadd.f32 %v1631_v14, %v1618_v10  ;;  %v4763_v10 = vld [vmem:[#allocation4 + $0x3ec] sm:$0xf] }
 0x163   :  { %2597 = vmatpush.bf16.msrb.mxu2 %v4101_v1  ;;  %v4070_v1 = vld [vmem:[#allocation4 + $0x218] sm:$0xf0] }
 0x164   :  { %v1646_v22 = vadd.f32 %v1645_v19, %v1632_v16  ;;  %v1659_v24 = vpop.f32.mrf.mxu1  ;;  %v4073_v3 = vor.u32 %v4703_v0, %v4070_v1  ;;  %v4297_v16 = vor.u32 %v4759_v15, %v4294_v35  ;;  %v4281_v19 = vor.u32 %v4755_v17, %v4278_v18  ;;  %2951 = vmatpush.bf16.msrb.mxu3 %v4770_v45  ;;  %v4782_v17 = vld [vmem:[%s5166_s5 + $0x80] sm:$0xff]  ;;  %v4797_v18 = vld [vmem:[%s5166_s5 + $0xf8] sm:$0xff] }
 0x166   :  { %v1660_v26 = vadd.f32 %v1659_v24, %v1646_v22  ;;  %v4751_v22 = vld [vmem:[#allocation4 + $0x38c] sm:$0xf]  ;;  %v4246_v24 = vld [vmem:[#allocation4 + $0x378] sm:$0xf0] }
 0x167   :  { %2598 = vmatpush.bf16.msrb.mxu2 %v4085_v12  ;;  %v4310_v12 = vld [vmem:[#allocation4 + $0x3f8] sm:$0xf0] }
 0x168   :  { %v1669_v29 = vmax.f32 %v1660_v26, 0.0  ;;  %v4313_v14 = vor.u32 %v4763_v10, %v4310_v12 }
 0x16a   :  { %v5039_v33 = vpack.c.bf16 %v1669_v29, %v1665_v21  ;;  %v4217_v21 = vor.u32 %v4739_v50, %v4214_v28  ;;  %v4735_v29 = vld [vmem:[#allocation4 + $0x30c] sm:$0xf] }
 0x16b   :  { %2599 = vmatpush.bf16.msrb.mxu2 %v4069_v20  ;;  %v4262_v20 = vld [vmem:[#allocation4 + $0x398] sm:$0xf0] }
 0x16c   :  { %2502 = vmatmul.bf16.vlgmr.msrb.gmra.mxu0 %v5039_v33  ;;  %v4265_v23 = vor.u32 %v4751_v22, %v4262_v20 }
 0x16d   :  { %2606 = vmatpush.bf16.msrb.mxu0 %v4309_v31 }
 0x16e   :  { %2600 = vmatmul.bf16.vlgmr.msrb.gmra.mxu2 %v5033_v27 }
 0x16f   :  { %2648 = vmatpush.bf16.msra.mxu2 %v4185_v55  ;;  %v4747_v55 = vld [vmem:[#allocation4 + $0x36c] sm:$0xf] }
 0x170   :  { %v4249_v25 = vor.u32 %v4747_v55, %v4246_v24  ;;  %v4796_v55 = vld [vmem:[%s5166_s5 + $0xf0] sm:$0xff] }
 0x171   :  { %2607 = vmatpush.bf16.msrb.mxu0 %v4293_v38  ;;  %v4768_v38 = vld [vmem:[%s5166_s5 + $0x10] sm:$0xff] }
 0x173   :  { %2649 = vmatpush.bf16.msra.mxu2 %v4169_v30  ;;  %v4198_v30 = vld [vmem:[#allocation4 + $0x318] sm:$0xf0] }
 0x174   :  { %v4201_v31 = vor.u32 %v4735_v29, %v4198_v30  ;;  %v4794_v29 = vld [vmem:[%s5166_s5 + $0xe0] sm:$0xff] }
 0x175   :  { %2608 = vmatpush.bf16.msrb.mxu0 %v4277_v46  ;;  %v4777_v46 = vld [vmem:[%s5166_s5 + $0x58] sm:$0xff] }
 0x177   :  { %2650 = vmatpush.bf16.msra.mxu2 %v4153_v36  ;;  %v4781_v36 = vld [vmem:[%s5166_s5 + $0x78] sm:$0xff]  ;;  %v2461_v47 = vpop.f32.mrf.mxu3 }
 0x178   :  { %2962 = vmatpush.bf16.msrb.mxu1 %v4781_v36 }
 0x179   :  { %2609 = vmatpush.bf16.msrb.mxu0 %v4261_v51  ;;  %v4788_v51 = vld [vmem:[%s5166_s5 + $0xb0] sm:$0xff] }
 0x17b   :  { %2651 = vmatpush.bf16.msra.mxu2 %v4137_v54  ;;  %v4778_v54 = vld [vmem:[%s5166_s5 + $0x60] sm:$0xff] }
 0x17c   :  { %2558 = vmatmul.bf16.vlgmr.msra.gmra.mxu0 %v5039_v33  ;;  %2963 = vmatpush.bf16.msrb.mxu1 %v4780_v39  ;;  %v4793_v39 = vld [vmem:[%s5166_s5 + $0xd8] sm:$0xff] }
 0x17d   :  { %2610 = vmatpush.bf16.msrb.mxu0 %v4245_v37  ;;  %v4786_v37 = vld [vmem:[%s5166_s5 + $0xa0] sm:$0xff] }
 0x17f   :  { %2652 = vmatpush.bf16.msra.mxu2 %v4121_v49  ;;  %v4776_v49 = vld [vmem:[%s5166_s5 + $0x50] sm:$0xff]  ;;  %v2463_v58 = vpop.f32.mrf.mxu3 }
 0x180   :  { %2964 = vmatpush.bf16.msrb.mxu1 %v4779_v43  ;;  %v2464_v0 = vadd.f32 %v2463_v58, %v1804_v40 }
 0x181   :  { %2611 = vmatpush.bf16.msrb.mxu0 %v4229_v61  ;;  %v2462_v61 = vadd.f32 %v2461_v47, %v1804_v40 }
 0x183   :  { %2653 = vmatpush.bf16.msra.mxu2 %v4105_v57  ;;  %v4774_v57 = vld [vmem:[%s5166_s5 + $0x40] sm:$0xff] }
 0x184   :  { %2965 = vmatpush.bf16.msrb.mxu1 %v4778_v54 }
 0x185   :  { %2612 = vmatpush.bf16.msrb.mxu0 %v4213_v5 }
 0x187   :  { %2654 = vmatpush.bf16.msra.mxu2 %v4089_v62 }
 0x188   :  { %2966 = vmatpush.bf16.msrb.mxu1 %v4777_v46 }
 0x189   :  { %2613 = vmatpush.bf16.msrb.mxu0 %v4197_v13  ;;  %v4783_v13 = vld [vmem:[%s5166_s5 + $0x88] sm:$0xff] }
 0x18b   :  { %2655 = vmatpush.bf16.msra.mxu2 %v4073_v3 }
 0x18c   :  { %2614 = vmatmul.bf16.vlgmr.msrb.gmra.mxu0 %v5039_v33  ;;  %2967 = vmatpush.bf16.msrb.mxu1 %v4776_v49  ;;  %v4791_v49 = vld [vmem:[%s5166_s5 + $0xc8] sm:$0xff] }
 0x18d   :  { %2662 = vmatpush.bf16.msra.mxu0 %v4313_v14 }
 0x18e   :  { %2656 = vmatmul.bf16.vlgmr.msra.gmra.mxu2 %v5033_v27  ;;  %v4743_v27 = vld [vmem:[#allocation4 + $0x34c] sm:$0xf] }
 0x18f   :  { %v4233_v26 = vor.u32 %v4743_v27, %v4230_v4  ;;  %v2475_v7 = vpop.f32.mrf.mxu1  ;;  %2976 = vmatpush.bf16.msrb.mxu2 %v4789_v9  ;;  %v4795_v4 = vld [vmem:[%s5166_s5 + $0xe8] sm:$0xff] }
 0x190   :  { %2968 = vmatpush.bf16.msrb.mxu1 %v4775_v52  ;;  %v2476_v1 = vadd.f32 %v2475_v7, %v2462_v61 }
 0x191   :  { %2663 = vmatpush.bf16.msra.mxu0 %v4297_v16 }
 0x193   :  { %2977 = vmatpush.bf16.msrb.mxu2 %v4788_v51 }
 0x194   :  { %2969 = vmatpush.bf16.msrb.mxu1 %v4774_v57 }
 0x195   :  { %2664 = vmatpush.bf16.msra.mxu0 %v4281_v19  ;;  %v1805_v19 = vperm.slane %v5104_v56, 1 }
 0x197   :  { %2978 = vmatpush.bf16.msrb.mxu2 %v4787_v53  ;;  %v2477_v60 = vpop.f32.mrf.mxu1  ;;  %v2517_v63 = vpop.f32.mrf.mxu3 }
 0x198   :  { %v2478_v5 = vadd.f32 %v2477_v60, %v2464_v0  ;;  %v2518_v27 = vadd.f32 %v2517_v63, %v1805_v19 }
 0x199   :  { %2665 = vmatpush.bf16.msra.mxu0 %v4265_v23 }
 0x19b   :  { %2979 = vmatpush.bf16.msrb.mxu2 %v4786_v37  ;;  %v4790_v37 = vld [vmem:[%s5166_s5 + $0xc0] sm:$0xff] }
 0x19d   :  { %2666 = vmatpush.bf16.msra.mxu0 %v4249_v25 }
 0x19f   :  { %2980 = vmatpush.bf16.msrb.mxu2 %v4785_v42  ;;  %v2531_v3 = vpop.f32.mrf.mxu1  ;;  %v2519_v20 = vpop.f32.mrf.mxu3 }
 0x1a0   :  { %v2532_v50 = vadd.f32 %v2531_v3, %v2518_v27 }
 0x1a1   :  { %2667 = vmatpush.bf16.msra.mxu0 %v4233_v26  ;;  %v2520_v26 = vadd.f32 %v2519_v20, %v1805_v19 }
 0x1a3   :  { %2981 = vmatpush.bf16.msrb.mxu2 %v4784_v2  ;;  %v1807_v2 = vperm.slane %v5104_v56, 3 }
 0x1a5   :  { %2668 = vmatpush.bf16.msra.mxu0 %v4217_v21 }
 0x1a7   :  { %2982 = vmatpush.bf16.msrb.mxu2 %v4783_v13  ;;  %v2533_v23 = vpop.f32.mrf.mxu1 }
 0x1a8   :  { %v2534_v28 = vadd.f32 %v2533_v23, %v2520_v26 }
 0x1a9   :  { %2669 = vmatpush.bf16.msra.mxu0 %v4201_v31 }
 0x1ab   :  { %2983 = vmatpush.bf16.msrb.mxu2 %v4782_v17 }
 0x1ac   :  { %2670 = vmatmul.bf16.vlgmr.msra.gmra.mxu0 %v5039_v33  ;;  %v4769_v33 = vld [vmem:[%s5166_s5 + $0x18] sm:$0xff] }
 0x1ad   :  { %2952 = vmatpush.bf16.msrb.mxu3 %v4769_v33  ;;  %2990 = vmatpush.bf16.msrb.mxu0 %v4797_v18 }
 0x1b0   :  { %v2587_v8 = vpop.f32.mrf.mxu1 }
 0x1b1   :  { %2953 = vmatpush.bf16.msrb.mxu3 %v4768_v38  ;;  %2991 = vmatpush.bf16.msrb.mxu0 %v4796_v55 }
 0x1b5   :  { %2954 = vmatpush.bf16.msrb.mxu3 %v4767_v41  ;;  %2992 = vmatpush.bf16.msrb.mxu0 %v4795_v4  ;;  %v1806_v41 = vperm.slane %v5104_v56, 2  ;;  %v4802_v56 = vld [vmem:[%s5167_s6] ss:$0 sm:$0xff] }
 0x1b7   :  { %v2573_v30 = vpop.f32.mrf.mxu3 }
 0x1b8   :  { %v2574_v9 = vadd.f32 %v2573_v30, %v1806_v41  ;;  %v2589_v7 = vpop.f32.mrf.mxu1 }
 0x1b9   :  { %2955 = vmatpush.bf16.msrb.mxu3 %v4766_v44  ;;  %2993 = vmatpush.bf16.msrb.mxu0 %v4794_v29  ;;  %v4792_v44 = vld [vmem:[%s5166_s5 + $0xd0] sm:$0xff] }
 0x1bd   :  { %2994 = vmatpush.bf16.msrb.mxu0 %v4793_v39 }
 0x1bf   :  { %v2575_v54 = vpop.f32.mrf.mxu3 }
 0x1c0   :  { %v2576_v47 = vadd.f32 %v2575_v54, %v1806_v41 }
 0x1c1   :  { %2995 = vmatpush.bf16.msrb.mxu0 %v4792_v44 }
 0x1c2   :  { %v2590_v52 = vadd.f32 %v2589_v7, %v2576_v47 }
 0x1c5   :  { %2996 = vmatpush.bf16.msrb.mxu0 %v4791_v49 }
 0x1c9   :  { %2997 = vmatpush.bf16.msrb.mxu0 %v4790_v37 }
 0x1cb   :  { %v2489_v48 = vpop.f32.mrf.mxu2 }
 0x1cc   :  { %v2490_v6 = vadd.f32 %v2489_v48, %v2476_v1  ;;  %v2588_v48 = vadd.f32 %v2587_v8, %v2574_v9 }
 0x1d2   :  { %v2643_v0 = vpop.f32.mrf.mxu1 }
 0x1d3   :  { %v2491_v59 = vpop.f32.mrf.mxu2 }
 0x1d4   :  { %v2492_v10 = vadd.f32 %v2491_v59, %v2478_v5 }
 0x1d7   :  { %v2629_v61 = vpop.f32.mrf.mxu3 }
 0x1d8   :  { %v2630_v5 = vadd.f32 %v2629_v61, %v1807_v2 }
 0x1db   :  { %v2545_v11 = vpop.f32.mrf.mxu2 }
 0x1dc   :  { %v2546_v21 = vadd.f32 %v2545_v11, %v2532_v50 }
 0x1df   :  { %v2631_v63 = vpop.f32.mrf.mxu3 }
 0x1e0   :  { %v2632_v11 = vadd.f32 %v2631_v63, %v1807_v2 }
 0x1e3   :  { %v2547_v24 = vpop.f32.mrf.mxu2 }
 0x1e4   :  { %v2548_v31 = vadd.f32 %v2547_v24, %v2534_v28 }
 0x1e9   :  { %v2503_v62 = vpop.f32.mrf.mxu0 }
 0x1ea   :  { %v2504_v12 = vadd.f32 %v2503_v62, %v2490_v6  ;;  %v2645_v6 = vpop.f32.mrf.mxu1 }
 0x1eb   :  { %v2646_v13 = vadd.f32 %v2645_v6, %v2632_v11 }
 0x1ec   :  { %v2676_v35 = vmax.f32 %v2504_v12, 0.0 }
 0x1f1   :  { %v2505_v14 = vpop.f32.mrf.mxu0  ;;  %v2601_v33 = vpop.f32.mrf.mxu2 }
 0x1f2   :  { %v2506_v15 = vadd.f32 %v2505_v14, %v2492_v10  ;;  %v2602_v53 = vadd.f32 %v2601_v33, %v2588_v48  ;;  %v2644_v10 = vadd.f32 %v2643_v0, %v2630_v5 }
 0x1f4   :  { %v2680_v16 = vmax.f32 %v2506_v15, 0.0 }
 0x1f6   :  { %v2684_v22 = vpack.c.bf16 %v2680_v16, %v2676_v35 }
 0x1f8   :  { %2956 = vmatmul.bf16.vlgmr.msrb.gmra.mxu3 %v2684_v22 }
 0x1f9   :  { %v2559_v25 = vpop.f32.mrf.mxu0  ;;  %v2603_v51 = vpop.f32.mrf.mxu2 }
 0x1fa   :  { %v2560_v32 = vadd.f32 %v2559_v25, %v2546_v21  ;;  %v2604_v60 = vadd.f32 %v2603_v51, %v2590_v52 }
 0x1fc   :  { %v2677_v36 = vmax.f32 %v2560_v32, 0.0 }
 0x201   :  { %v2561_v34 = vpop.f32.mrf.mxu0 }
 0x202   :  { %v2562_v45 = vadd.f32 %v2561_v34, %v2548_v31 }
 0x204   :  { %v2681_v38 = vmax.f32 %v2562_v45, 0.0 }
 0x206   :  { %v2685_v43 = vpack.c.bf16 %v2681_v38, %v2677_v36 }
 0x208   :  { %2970 = vmatmul.bf16.vlgmr.msrb.gmra.mxu1 %v2685_v43 }
 0x209   :  { %v2615_v46 = vpop.f32.mrf.mxu0 }
 0x20a   :  { %v2616_v57 = vadd.f32 %v2615_v46, %v2602_v53 }
 0x20c   :  { %v2678_v40 = vmax.f32 %v2616_v57, 0.0 }
 0x211   :  { %v2617_v58 = vpop.f32.mrf.mxu0  ;;  %v2657_v1 = vpop.f32.mrf.mxu2 }
 0x212   :  { %v2618_v59 = vadd.f32 %v2617_v58, %v2604_v60  ;;  %v2658_v14 = vadd.f32 %v2657_v1, %v2644_v10 }
 0x214   :  { %v2682_v42 = vmax.f32 %v2618_v59, 0.0 }
 0x216   :  { %v2686_v62 = vpack.c.bf16 %v2682_v42, %v2678_v40 }
 0x218   :  { %2984 = vmatmul.bf16.vlgmr.msrb.gmra.mxu2 %v2686_v62 }
 0x219   :  { %v2659_v12 = vpop.f32.mrf.mxu2 }
 0x21a   :  { %v2660_v15 = vadd.f32 %v2659_v12, %v2646_v13 }
 0x229   :  { %v2671_v3 = vpop.f32.mrf.mxu0 }
 0x22a   :  { %v2672_v35 = vadd.f32 %v2671_v3, %v2658_v14 }
 0x22c   :  { %v2679_v18 = vmax.f32 %v2672_v35, 0.0 }
 0x231   :  { %v2673_v16 = vpop.f32.mrf.mxu0 }
 0x232   :  { %v2674_v17 = vadd.f32 %v2673_v16, %v2660_v15 }
 0x234   :  { %v2683_v19 = vmax.f32 %v2674_v17, 0.0 }
 0x236   :  { %v2687_v22 = vpack.c.bf16 %v2683_v19, %v2679_v18 }
 0x238   :  { %2998 = vmatmul.bf16.vlgmr.msrb.gmra.mxu0 %v2687_v22 }
 0x27b   :  { %v2957_v20 = vpop.f32.mrf.mxu3 }
 0x27c   :  { %v2958_v24 = vadd.f32 %v4802_v56, %v2957_v20 }
 0x283   :  { %v2959_v4 = vpop.f32.mrf.mxu3 }
 0x284   :  { %v2960_v21 = vadd.f32 %v4802_v56, %v2959_v4 }
 0x285   :  { %v2971_v23 = vpop.f32.mrf.mxu1 }
 0x286   :  { %v2972_v25 = vadd.f32 %v2971_v23, %v2958_v24 }
 0x28d   :  { %v2973_v28 = vpop.f32.mrf.mxu1 }
 0x28e   :  { %v2974_v31 = vadd.f32 %v2973_v28, %v2960_v21 }
 0x29b   :  { %v2985_v55 = vpop.f32.mrf.mxu2 }
 0x29c   :  { %v2986_v27 = vadd.f32 %v2985_v55, %v2972_v25 }
 0x2a3   :  { %v2987_v30 = vpop.f32.mrf.mxu2 }
 0x2a4   :  { %v2988_v32 = vadd.f32 %v2987_v30, %v2974_v31 }
 0x2b5   :  { %v2999_v26 = vpop.f32.mrf.mxu0 }
 0x2b6   :  { %v3000_v50 = vadd.f32 %v2999_v26, %v2986_v27 }
 0x2b8   :  { %v3004_v29 = vmax.f32 %v3000_v50, 0.0 }
 0x2ba   :  { %3006 = vst [vmem:[%s5168_s7] sm:$0xff] %v3004_v29 }
 0x2bd   :  { %v3001_v8 = vpop.f32.mrf.mxu0 }
 0x2be   :  { %v3002_v34 = vadd.f32 %v3001_v8, %v2988_v32 }
 0x2c0   :  { %v3005_v45 = vmax.f32 %v3002_v34, 0.0 }
 0x2c2   :  { %3007 = vst [vmem:[%s5168_s7 + $0x8] sm:$0xff] %v3005_v45 }
 0x2c3   :  { %3012 = vsyncpa [#allocation3], 1 }
 0x2c4   :  { %3013 = vsyncpa [#allocation5], 1 }

</bundles_post_ra>
